<compile_context>
chip_gen: v6e
topology: v6e:2x2x1
jax: 0.10.0
libtpu: 0.0.40
codegen_flags: <defaults>
</compile_context>

<pallas_src>
import math
import functools

import numpy as np
import jax
import jax.numpy as jnp
from jax import lax
from jax.experimental import pallas as pl
from jax.experimental.pallas import tpu as pltpu

MAX_FLOW = 400.0
GAMMA = 0.8
MIN_VARIANCE = 1e-4

_NUM_METRICS = 5  # valid_sum, epe_sum, epe<1, epe<3, epe<5


def _raft_loss_kernel(gt_ref, vm_ref, *rest, num_preds, max_flow, min_variance,
                      height, tile_rows):
    """One (batch, row-tile) block.

    gt_ref:  [1, 2, TH, W]  ground-truth flow block (u, v channels), native dtype
    vm_ref:  [1, TH, W]     raw validity-mask block, native dtype
    rest:    mean_0, var_0, ..., mean_{N-1}, var_{N-1} (each [1, 2, TH, W]),
             then out_ref [1, 1, 8, 128] holding this block's partial sums in
             row 0, lanes 0..N+4:
             [core_sum_0 .. core_sum_{N-1}, valid_sum, epe_sum, epe<1, epe<3, epe<5]
             where core = |du|/vu + |dv|/vv + log(vu*vv)  (0.5 and +0.5*log(2pi)
             are applied in the JAX-side combine).
    """
    out_ref = rest[-1]
    pred_refs = rest[:-1]

    # In-register casts: inputs are streamed in their native (possibly bf16)
    # dtype to halve HBM traffic; all math is f32.
    gt_u = gt_ref[0, 0].astype(jnp.float32)
    gt_v = gt_ref[0, 1].astype(jnp.float32)
    vm = vm_ref[0].astype(jnp.float32)

    # |gt|^2 < max_flow^2 avoids a per-pixel sqrt on the EUP.
    mag2 = gt_u * gt_u + gt_v * gt_v
    # Tail-row mask for the cdiv grid: rows past H are padding / stale VMEM.
    row_ids = pl.program_id(1) * tile_rows + lax.broadcasted_iota(
        jnp.int32, gt_u.shape, 0)
    valid = (vm >= 0.5) & (mag2 < max_flow * max_flow) & (row_ids < height)

    scalars = []
    du = dv = None
    for i in range(num_preds):          # static unrolled loop; per-iteration
        m_ref = pred_refs[2 * i]        # ref loads keep live ranges bounded
        v_ref = pred_refs[2 * i + 1]
        mu = m_ref[0, 0].astype(jnp.float32)
        mv = m_ref[0, 1].astype(jnp.float32)
        vu = jnp.maximum(v_ref[0, 0].astype(jnp.float32), min_variance)
        vv = jnp.maximum(v_ref[0, 1].astype(jnp.float32), min_variance)
        du = gt_u - mu
        dv = gt_v - mv
        # Fold the two divides into one and reuse the product for the log:
        #   |du|/vu + |dv|/vv + log(vu) + log(vv)
        # = (|du|*vv + |dv|*vu) / (vu*vv) + log(vu*vv)
        p = vu * vv
        core = (jnp.abs(du) * vv + jnp.abs(dv) * vu) / p + jnp.log(p)
        # where() (not *valid) so NaN/Inf in padded tail rows cannot poison sums
        scalars.append(jnp.sum(jnp.where(valid, core, 0.0)))

    # EPE of the last prediction reuses du/dv from the final loop iteration.
    epe = jnp.sqrt(du * du + dv * dv)
    scalars.append(jnp.sum(valid.astype(jnp.float32)))
    scalars.append(jnp.sum(jnp.where(valid, epe, 0.0)))
    scalars.append(jnp.sum(jnp.where(valid & (epe < 1.0), 1.0, 0.0)))
    scalars.append(jnp.sum(jnp.where(valid & (epe < 3.0), 1.0, 0.0)))
    scalars.append(jnp.sum(jnp.where(valid & (epe < 5.0), 1.0, 0.0)))

    # Pack the N+5 scalars into row 0 of an (8,128)-aligned output tile so the
    # output BlockSpec stays lane/sublane aligned and every grid step writes
    # its own block (no cross-step accumulator -> both grid axes 'parallel').
    # Broadcast masks are hoisted out of the packing loop.
    row = lax.broadcasted_iota(jnp.int32, (8, 128), 0)
    lane = lax.broadcasted_iota(jnp.int32, (8, 128), 1)
    row0 = row == 0
    tile = jnp.zeros((8, 128), jnp.float32)
    for j, s in enumerate(scalars):
        tile = jnp.where(row0 & (lane == j), s, tile)
    out_ref[0, 0, :, :] = tile


def _round_up(x, m):
    return ((x + m - 1) // m) * m


def _cdiv(a, b):
    return (a + b - 1) // b


def _hw_budgets():
    """(per-step VMEM budget, scoped vmem_limit_bytes) by chip generation."""
    try:
        info = pltpu.get_tpu_info()
        vmem_cap = getattr(info, "vmem_capacity_bytes", None)
    except Exception:
        vmem_cap = None
    if vmem_cap is None or vmem_cap <= 64 * 1024 * 1024:
        # v7x-class (64 MiB physical VMEM) or unknown: stay well under cap.
        return 16 * 1024 * 1024, 44 * 1024 * 1024
    # v5e/v6e-class (128 MiB physical VMEM): fewer, fatter grid steps.
    return 24 * 1024 * 1024, 72 * 1024 * 1024


def _choose_tile_rows(H, bytes_per_row, sublane, budget_bytes, batch):
    """Largest sublane-aligned row tile whose per-grid-step footprint stays
    under the budget (no divisor-of-H requirement; tail rows are masked).
    Prefers an even total block count B*ceil(H/th) for the v7x megacore split,
    as long as that costs no more than a 2x smaller tile."""
    if H < sublane:
        return H                       # full dim is always a legal block
    aligned_cap = (H // sublane) * sublane
    max_rows = (budget_bytes // max(bytes_per_row, 1)) // sublane * sublane
    best = max(sublane, min(aligned_cap, max_rows))
    if (batch * _cdiv(H, best)) % 2 == 1 and best > sublane:
        th = best - sublane
        lo = max(sublane, best // 2)
        while th >= lo:
            if (batch * _cdiv(H, th)) % 2 == 0:
                return th
            th -= sublane
    return best


def raft_uncertainty_loss(flow_preds, flow_gt, flow_valid_mask,
                          gamma=GAMMA, max_flow=MAX_FLOW,
                          min_variance=MIN_VARIANCE, max_tile_rows=None):
    """flow_preds: list of (mean [B,2,H,W], variance [B,2,H,W]).
    Inputs may be f32 or bf16/f16; they are streamed in native dtype."""
    num_preds = len(flow_preds)
    B, C, H, W = flow_gt.shape
    assert C == 2

    pred_args = []
    for m, v in flow_preds:              # unstacked, uncast -> no extra HBM
        pred_args.append(m)              # copies before the kernel runs
        pred_args.append(v)

    # Sublane row multiple follows the narrowest streamed dtype.
    sub = 8
    for a in (flow_gt, flow_valid_mask, *pred_args):
        if a.dtype.itemsize == 2:
            sub = max(sub, 16)
        elif a.dtype.itemsize == 1:
            sub = max(sub, 32)

    # Per-row HBM bytes at native dtypes (gt: 2ch, mask: 1ch, preds: 2ch each).
    bytes_per_row = (2 * W * flow_gt.dtype.itemsize
                     + W * flow_valid_mask.dtype.itemsize
                     + sum(2 * W * a.dtype.itemsize for a in pred_args))

    budget, vmem_limit = _hw_budgets()
    th = _choose_tile_rows(H, bytes_per_row, sub, budget, batch=B)
    if max_tile_rows is not None:
        th = min(th, max(sub, _round_up(max_tile_rows, sub)))
        th = min(th, _round_up(H, sub))
    T = _cdiv(H, th)
    n_out = num_preds + _NUM_METRICS

    flow_spec = pl.BlockSpec((1, 2, th, W), lambda b, t: (b, 0, t, 0))
    mask_spec = pl.BlockSpec((1, th, W), lambda b, t: (b, t, 0))
    out_spec = pl.BlockSpec((1, 1, 8, 128), lambda b, t: (b, t, 0, 0))

    kernel = functools.partial(_raft_loss_kernel, num_preds=num_preds,
                               max_flow=float(max_flow),
                               min_variance=float(min_variance),
                               height=H, tile_rows=th)

    partials = pl.pallas_call(
        kernel,
        out_shape=jax.ShapeDtypeStruct((B, T, 8, 128), jnp.float32),
        grid=(B, T),
        in_specs=[flow_spec, mask_spec] + [flow_spec] * (2 * num_preds),
        out_specs=out_spec,
        compiler_params=pltpu.CompilerParams(
            dimension_semantics=("parallel", "parallel"),
            vmem_limit_bytes=vmem_limit),
    )(flow_gt, flow_valid_mask, *pred_args)

    # Tiny cross-block combine in JAX (tree reduce; also the megacore join).
    sums = jnp.sum(partials[:, :, 0, :n_out], axis=(0, 1))

    valid_sum = sums[num_preds]
    half_log_2pi = 0.5 * math.log(2.0 * math.pi)
    total_loss = jnp.float32(0.0)
    for i in range(num_preds):
        w = gamma ** (num_preds - i - 1)
        # 0.5 scale and the +0.5*log(2*pi) constant hoisted out of the kernel.
        flow_loss_i = 0.5 * sums[i] / valid_sum + half_log_2pi
        total_loss = total_loss + w * flow_loss_i

    metrics = {
        'flow_loss': total_loss,
        'epe': sums[num_preds + 1] / valid_sum,
        '1px': sums[num_preds + 2] / valid_sum,
        '3px': sums[num_preds + 3] / valid_sum,
        '5px': sums[num_preds + 4] / valid_sum,
    }
    return total_loss, metrics


def _reference(flow_preds, flow_gt, flow_valid_mask,
               gamma=GAMMA, max_flow=MAX_FLOW, min_variance=MIN_VARIANCE):
    """Plain-JAX reproduction of the PyTorch module (nll_loss_v2 path)."""
    gt = flow_gt.astype(jnp.float32)
    vm = flow_valid_mask.astype(jnp.float32)
    mag = jnp.sqrt(jnp.sum(gt ** 2, axis=1))
    valid = ((vm >= 0.5) & (mag < max_flow)).astype(jnp.float32)
    n = len(flow_preds)
    total = 0.0
    for i, (m, v) in enumerate(flow_preds):
        m = m.astype(jnp.float32)
        v = jnp.maximum(v.astype(jnp.float32), min_variance)
        nll = 0.5 * jnp.sum(jnp.abs(gt - m) / v + jnp.log(v), axis=1) \
              + 0.5 * math.log(2 * math.pi)
        fl = jnp.sum(nll * valid) / jnp.sum(valid)
        total = total + gamma ** (n - i - 1) * fl
    epe = jnp.sqrt(jnp.sum((flow_preds[-1][0].astype(jnp.float32) - gt) ** 2,
                           axis=1))
    vs = jnp.sum(valid)
    return total, {
        'epe': jnp.sum(epe * valid) / vs,
        '1px': jnp.sum((epe < 1.0) * valid) / vs,
        '3px': jnp.sum((epe < 3.0) * valid) / vs,
        '5px': jnp.sum((epe < 5.0) * valid) / vs,
    }


if __name__ == "__main__":
    num_preds = 3
    key = jax.random.PRNGKey(0)

    def make_inputs(case_key, B, H, W, dtype):
        k_gt, k_mask, *k_preds = jax.random.split(case_key, 2 + 2 * num_preds)
        gt = 5.0 * jax.random.normal(k_gt, (B, 2, H, W), dtype=jnp.float32)
        # a few pixels exceed max_flow so the magnitude gate is exercised
        gt = gt.at[0, :, :2, :2].set(500.0)
        mask = jax.random.uniform(k_mask, (B, H, W), dtype=jnp.float32)
        preds = []
        for i in range(num_preds):
            km, kv = k_preds[2 * i], k_preds[2 * i + 1]
            mean = gt + jax.random.normal(km, (B, 2, H, W), dtype=jnp.float32)
            var = jnp.exp(0.5 * jax.random.normal(kv, (B, 2, H, W),
                                                  dtype=jnp.float32))
            preds.append((mean.astype(dtype), var.astype(dtype)))
        return preds, gt.astype(dtype), mask

    # (dtype, H, W, forced max_tile_rows options)
    cases = [
        (jnp.float32, 32, 32, (None, 8)),    # divisible H: 1-tile + forced 4-tile grid
        (jnp.float32, 36, 32, (None, 16)),   # H not multiple of 8: cdiv grid + tail mask
        (jnp.bfloat16, 36, 32, (16,)),       # native bf16 streaming, 16-row sublane pack
    ]
    case_keys = jax.random.split(key, len(cases))

    for ck, (dtype, H, W, tile_opts) in zip(case_keys, cases):
        preds, gt, mask = make_inputs(ck, 2, H, W, dtype)
        ref_loss, ref_metrics = _reference(preds, gt, mask)
        ref_loss = np.asarray(jax.block_until_ready(ref_loss))

        for max_rows in tile_opts:
            total_loss, metrics = raft_uncertainty_loss(
                preds, gt, mask, max_tile_rows=max_rows)
            total_loss = jax.block_until_ready(total_loss)
            metrics = jax.tree_util.tree_map(jax.block_until_ready, metrics)

            assert np.allclose(np.asarray(total_loss), ref_loss,
                               rtol=2e-4, atol=2e-4), \
                (str(dtype), H, max_rows, float(total_loss), float(ref_loss))
            for k in ('epe', '1px', '3px', '5px'):
                assert np.allclose(np.asarray(metrics[k]),
                                   np.asarray(ref_metrics[k]),
                                   rtol=2e-4, atol=2e-4), \
                    (str(dtype), H, max_rows, k,
                     float(metrics[k]), float(ref_metrics[k]))

    print("KERNEL_OK")
</pallas_src>

<mosaic_0001>
module attributes {stable_mosaic.version = 11 : i64} {
  func.func @_raft_loss_kernel(%arg0: i32, %arg1: i32, %arg2: memref<1x2x32x32xf32, #tpu.memory_space<vmem>>, %arg3: memref<1x32x32xf32, #tpu.memory_space<vmem>>, %arg4: memref<1x2x32x32xf32, #tpu.memory_space<vmem>>, %arg5: memref<1x2x32x32xf32, #tpu.memory_space<vmem>>, %arg6: memref<1x2x32x32xf32, #tpu.memory_space<vmem>>, %arg7: memref<1x2x32x32xf32, #tpu.memory_space<vmem>>, %arg8: memref<1x2x32x32xf32, #tpu.memory_space<vmem>>, %arg9: memref<1x2x32x32xf32, #tpu.memory_space<vmem>>, %arg10: memref<1x1x8x128xf32, #tpu.memory_space<vmem>>) attributes {dimension_semantics = [#tpu.dimension_semantics<parallel>, #tpu.dimension_semantics<parallel>], iteration_bounds = array<i64: 2, 1>, scalar_prefetch = 0 : i64, scratch_operands = 0 : i64, tpu.core_type = #tpu.core_type<tc>, window_params = [{transform_indices = @transform_0, window_bounds = array<i64: 1, 2, 32, 32>}, {transform_indices = @transform_1, window_bounds = array<i64: 1, 32, 32>}, {transform_indices = @transform_2, window_bounds = array<i64: 1, 2, 32, 32>}, {transform_indices = @transform_3, window_bounds = array<i64: 1, 2, 32, 32>}, {transform_indices = @transform_4, window_bounds = array<i64: 1, 2, 32, 32>}, {transform_indices = @transform_5, window_bounds = array<i64: 1, 2, 32, 32>}, {transform_indices = @transform_6, window_bounds = array<i64: 1, 2, 32, 32>}, {transform_indices = @transform_7, window_bounds = array<i64: 1, 2, 32, 32>}, {transform_indices = @transform_8, window_bounds = array<i64: 1, 1, 8, 128>}]} {
    %c0 = arith.constant 0 : index
    %c0_0 = arith.constant 0 : index
    %c0_1 = arith.constant 0 : index
    %c0_2 = arith.constant 0 : index
    %0 = vector.load %arg2[%c0, %c0_0, %c0_1, %c0_2] : memref<1x2x32x32xf32, #tpu.memory_space<vmem>>, vector<1x1x32x32xf32>
    %1 = vector.shape_cast %0 : vector<1x1x32x32xf32> to vector<32x32xf32>
    %c0_3 = arith.constant 0 : index
    %c1 = arith.constant 1 : index
    %c0_4 = arith.constant 0 : index
    %c0_5 = arith.constant 0 : index
    %2 = vector.load %arg2[%c0_3, %c1, %c0_4, %c0_5] : memref<1x2x32x32xf32, #tpu.memory_space<vmem>>, vector<1x1x32x32xf32>
    %3 = vector.shape_cast %2 : vector<1x1x32x32xf32> to vector<32x32xf32>
    %c0_6 = arith.constant 0 : index
    %c0_7 = arith.constant 0 : index
    %c0_8 = arith.constant 0 : index
    %4 = vector.load %arg3[%c0_6, %c0_7, %c0_8] : memref<1x32x32xf32, #tpu.memory_space<vmem>>, vector<1x32x32xf32>
    %5 = vector.shape_cast %4 : vector<1x32x32xf32> to vector<32x32xf32>
    %6 = arith.mulf %1, %1 : vector<32x32xf32>
    %7 = arith.mulf %3, %3 : vector<32x32xf32>
    %8 = arith.addf %6, %7 : vector<32x32xf32>
    %c32_i32 = arith.constant 32 : i32
    %9 = arith.muli %arg1, %c32_i32 : i32
    %10 = tpu.iota {dimensions = array<i32: 0>} : vector<32x32xi32>
    %11 = vector.broadcast %9 : i32 to vector<32x32xi32>
    %12 = arith.addi %11, %10 : vector<32x32xi32>
    %cst = arith.constant 5.000000e-01 : f32
    %13 = vector.broadcast %cst : f32 to vector<32x32xf32>
    %14 = arith.cmpf oge, %5, %13 : vector<32x32xf32>
    %cst_9 = arith.constant 1.600000e+05 : f32
    %15 = vector.broadcast %cst_9 : f32 to vector<32x32xf32>
    %16 = arith.cmpf olt, %8, %15 : vector<32x32xf32>
    %17 = arith.andi %14, %16 : vector<32x32xi1>
    %c32_i32_10 = arith.constant 32 : i32
    %18 = vector.broadcast %c32_i32_10 : i32 to vector<32x32xi32>
    %19 = arith.cmpi slt, %12, %18 : vector<32x32xi32>
    %20 = arith.andi %17, %19 : vector<32x32xi1>
    %c0_11 = arith.constant 0 : index
    %c0_12 = arith.constant 0 : index
    %c0_13 = arith.constant 0 : index
    %c0_14 = arith.constant 0 : index
    %21 = vector.load %arg4[%c0_11, %c0_12, %c0_13, %c0_14] : memref<1x2x32x32xf32, #tpu.memory_space<vmem>>, vector<1x1x32x32xf32>
    %22 = vector.shape_cast %21 : vector<1x1x32x32xf32> to vector<32x32xf32>
    %c0_15 = arith.constant 0 : index
    %c1_16 = arith.constant 1 : index
    %c0_17 = arith.constant 0 : index
    %c0_18 = arith.constant 0 : index
    %23 = vector.load %arg4[%c0_15, %c1_16, %c0_17, %c0_18] : memref<1x2x32x32xf32, #tpu.memory_space<vmem>>, vector<1x1x32x32xf32>
    %24 = vector.shape_cast %23 : vector<1x1x32x32xf32> to vector<32x32xf32>
    %c0_19 = arith.constant 0 : index
    %c0_20 = arith.constant 0 : index
    %c0_21 = arith.constant 0 : index
    %c0_22 = arith.constant 0 : index
    %25 = vector.load %arg5[%c0_19, %c0_20, %c0_21, %c0_22] : memref<1x2x32x32xf32, #tpu.memory_space<vmem>>, vector<1x1x32x32xf32>
    %26 = vector.shape_cast %25 : vector<1x1x32x32xf32> to vector<32x32xf32>
    %cst_23 = arith.constant 9.99999974E-5 : f32
    %27 = vector.broadcast %cst_23 : f32 to vector<32x32xf32>
    %28 = arith.maximumf %26, %27 : vector<32x32xf32>
    %c0_24 = arith.constant 0 : index
    %c1_25 = arith.constant 1 : index
    %c0_26 = arith.constant 0 : index
    %c0_27 = arith.constant 0 : index
    %29 = vector.load %arg5[%c0_24, %c1_25, %c0_26, %c0_27] : memref<1x2x32x32xf32, #tpu.memory_space<vmem>>, vector<1x1x32x32xf32>
    %30 = vector.shape_cast %29 : vector<1x1x32x32xf32> to vector<32x32xf32>
    %cst_28 = arith.constant 9.99999974E-5 : f32
    %31 = vector.broadcast %cst_28 : f32 to vector<32x32xf32>
    %32 = arith.maximumf %30, %31 : vector<32x32xf32>
    %33 = arith.subf %1, %22 : vector<32x32xf32>
    %34 = arith.subf %3, %24 : vector<32x32xf32>
    %35 = arith.mulf %28, %32 : vector<32x32xf32>
    %36 = math.absf %33 : vector<32x32xf32>
    %37 = arith.mulf %36, %32 : vector<32x32xf32>
    %38 = math.absf %34 : vector<32x32xf32>
    %39 = arith.mulf %38, %28 : vector<32x32xf32>
    %40 = arith.addf %37, %39 : vector<32x32xf32>
    %41 = arith.divf %40, %35 : vector<32x32xf32>
    %42 = math.log %35 : vector<32x32xf32>
    %43 = arith.addf %41, %42 : vector<32x32xf32>
    %cst_29 = arith.constant 0.000000e+00 : f32
    %44 = vector.broadcast %cst_29 : f32 to vector<32x32xf32>
    %45 = arith.select %20, %43, %44 : vector<32x32xi1>, vector<32x32xf32>
    %46 = vector.shape_cast %45 : vector<32x32xf32> to vector<1x32x32xf32>
    %cst_30 = arith.constant dense<0.000000e+00> : vector<1xf32>
    %47 = vector.multi_reduction <add>, %46, %cst_30 [1, 2] : vector<1x32x32xf32> to vector<1xf32>
    %48 = vector.shape_cast %47 : vector<1xf32> to vector<1x1x1xf32>
    %49 = vector.extract %48[0, 0, 0] : f32 from vector<1x1x1xf32>
    %c0_31 = arith.constant 0 : index
    %c0_32 = arith.constant 0 : index
    %c0_33 = arith.constant 0 : index
    %c0_34 = arith.constant 0 : index
    %50 = vector.load %arg6[%c0_31, %c0_32, %c0_33, %c0_34] : memref<1x2x32x32xf32, #tpu.memory_space<vmem>>, vector<1x1x32x32xf32>
    %51 = vector.shape_cast %50 : vector<1x1x32x32xf32> to vector<32x32xf32>
    %c0_35 = arith.constant 0 : index
    %c1_36 = arith.constant 1 : index
    %c0_37 = arith.constant 0 : index
    %c0_38 = arith.constant 0 : index
    %52 = vector.load %arg6[%c0_35, %c1_36, %c0_37, %c0_38] : memref<1x2x32x32xf32, #tpu.memory_space<vmem>>, vector<1x1x32x32xf32>
    %53 = vector.shape_cast %52 : vector<1x1x32x32xf32> to vector<32x32xf32>
    %c0_39 = arith.constant 0 : index
    %c0_40 = arith.constant 0 : index
    %c0_41 = arith.constant 0 : index
    %c0_42 = arith.constant 0 : index
    %54 = vector.load %arg7[%c0_39, %c0_40, %c0_41, %c0_42] : memref<1x2x32x32xf32, #tpu.memory_space<vmem>>, vector<1x1x32x32xf32>
    %55 = vector.shape_cast %54 : vector<1x1x32x32xf32> to vector<32x32xf32>
    %cst_43 = arith.constant 9.99999974E-5 : f32
    %56 = vector.broadcast %cst_43 : f32 to vector<32x32xf32>
    %57 = arith.maximumf %55, %56 : vector<32x32xf32>
    %c0_44 = arith.constant 0 : index
    %c1_45 = arith.constant 1 : index
    %c0_46 = arith.constant 0 : index
    %c0_47 = arith.constant 0 : index
    %58 = vector.load %arg7[%c0_44, %c1_45, %c0_46, %c0_47] : memref<1x2x32x32xf32, #tpu.memory_space<vmem>>, vector<1x1x32x32xf32>
    %59 = vector.shape_cast %58 : vector<1x1x32x32xf32> to vector<32x32xf32>
    %cst_48 = arith.constant 9.99999974E-5 : f32
    %60 = vector.broadcast %cst_48 : f32 to vector<32x32xf32>
    %61 = arith.maximumf %59, %60 : vector<32x32xf32>
    %62 = arith.subf %1, %51 : vector<32x32xf32>
    %63 = arith.subf %3, %53 : vector<32x32xf32>
    %64 = arith.mulf %57, %61 : vector<32x32xf32>
    %65 = math.absf %62 : vector<32x32xf32>
    %66 = arith.mulf %65, %61 : vector<32x32xf32>
    %67 = math.absf %63 : vector<32x32xf32>
    %68 = arith.mulf %67, %57 : vector<32x32xf32>
    %69 = arith.addf %66, %68 : vector<32x32xf32>
    %70 = arith.divf %69, %64 : vector<32x32xf32>
    %71 = math.log %64 : vector<32x32xf32>
    %72 = arith.addf %70, %71 : vector<32x32xf32>
    %cst_49 = arith.constant 0.000000e+00 : f32
    %73 = vector.broadcast %cst_49 : f32 to vector<32x32xf32>
    %74 = arith.select %20, %72, %73 : vector<32x32xi1>, vector<32x32xf32>
    %75 = vector.shape_cast %74 : vector<32x32xf32> to vector<1x32x32xf32>
    %cst_50 = arith.constant dense<0.000000e+00> : vector<1xf32>
    %76 = vector.multi_reduction <add>, %75, %cst_50 [1, 2] : vector<1x32x32xf32> to vector<1xf32>
    %77 = vector.shape_cast %76 : vector<1xf32> to vector<1x1x1xf32>
    %78 = vector.extract %77[0, 0, 0] : f32 from vector<1x1x1xf32>
    %c0_51 = arith.constant 0 : index
    %c0_52 = arith.constant 0 : index
    %c0_53 = arith.constant 0 : index
    %c0_54 = arith.constant 0 : index
    %79 = vector.load %arg8[%c0_51, %c0_52, %c0_53, %c0_54] : memref<1x2x32x32xf32, #tpu.memory_space<vmem>>, vector<1x1x32x32xf32>
    %80 = vector.shape_cast %79 : vector<1x1x32x32xf32> to vector<32x32xf32>
    %c0_55 = arith.constant 0 : index
    %c1_56 = arith.constant 1 : index
    %c0_57 = arith.constant 0 : index
    %c0_58 = arith.constant 0 : index
    %81 = vector.load %arg8[%c0_55, %c1_56, %c0_57, %c0_58] : memref<1x2x32x32xf32, #tpu.memory_space<vmem>>, vector<1x1x32x32xf32>
    %82 = vector.shape_cast %81 : vector<1x1x32x32xf32> to vector<32x32xf32>
    %c0_59 = arith.constant 0 : index
    %c0_60 = arith.constant 0 : index
    %c0_61 = arith.constant 0 : index
    %c0_62 = arith.constant 0 : index
    %83 = vector.load %arg9[%c0_59, %c0_60, %c0_61, %c0_62] : memref<1x2x32x32xf32, #tpu.memory_space<vmem>>, vector<1x1x32x32xf32>
    %84 = vector.shape_cast %83 : vector<1x1x32x32xf32> to vector<32x32xf32>
    %cst_63 = arith.constant 9.99999974E-5 : f32
    %85 = vector.broadcast %cst_63 : f32 to vector<32x32xf32>
    %86 = arith.maximumf %84, %85 : vector<32x32xf32>
    %c0_64 = arith.constant 0 : index
    %c1_65 = arith.constant 1 : index
    %c0_66 = arith.constant 0 : index
    %c0_67 = arith.constant 0 : index
    %87 = vector.load %arg9[%c0_64, %c1_65, %c0_66, %c0_67] : memref<1x2x32x32xf32, #tpu.memory_space<vmem>>, vector<1x1x32x32xf32>
    %88 = vector.shape_cast %87 : vector<1x1x32x32xf32> to vector<32x32xf32>
    %cst_68 = arith.constant 9.99999974E-5 : f32
    %89 = vector.broadcast %cst_68 : f32 to vector<32x32xf32>
    %90 = arith.maximumf %88, %89 : vector<32x32xf32>
    %91 = arith.subf %1, %80 : vector<32x32xf32>
    %92 = arith.subf %3, %82 : vector<32x32xf32>
    %93 = arith.mulf %86, %90 : vector<32x32xf32>
    %94 = math.absf %91 : vector<32x32xf32>
    %95 = arith.mulf %94, %90 : vector<32x32xf32>
    %96 = math.absf %92 : vector<32x32xf32>
    %97 = arith.mulf %96, %86 : vector<32x32xf32>
    %98 = arith.addf %95, %97 : vector<32x32xf32>
    %99 = arith.divf %98, %93 : vector<32x32xf32>
    %100 = math.log %93 : vector<32x32xf32>
    %101 = arith.addf %99, %100 : vector<32x32xf32>
    %cst_69 = arith.constant 0.000000e+00 : f32
    %102 = vector.broadcast %cst_69 : f32 to vector<32x32xf32>
    %103 = arith.select %20, %101, %102 : vector<32x32xi1>, vector<32x32xf32>
    %104 = vector.shape_cast %103 : vector<32x32xf32> to vector<1x32x32xf32>
    %cst_70 = arith.constant dense<0.000000e+00> : vector<1xf32>
    %105 = vector.multi_reduction <add>, %104, %cst_70 [1, 2] : vector<1x32x32xf32> to vector<1xf32>
    %106 = vector.shape_cast %105 : vector<1xf32> to vector<1x1x1xf32>
    %107 = vector.extract %106[0, 0, 0] : f32 from vector<1x1x1xf32>
    %108 = arith.mulf %91, %91 : vector<32x32xf32>
    %109 = arith.mulf %92, %92 : vector<32x32xf32>
    %110 = arith.addf %108, %109 : vector<32x32xf32>
    %111 = math.sqrt %110 : vector<32x32xf32>
    %112 = arith.extui %20 : vector<32x32xi1> to vector<32x32xi32>
    %113 = arith.sitofp %112 : vector<32x32xi32> to vector<32x32xf32>
    %114 = vector.shape_cast %113 : vector<32x32xf32> to vector<1x32x32xf32>
    %cst_71 = arith.constant dense<0.000000e+00> : vector<1xf32>
    %115 = vector.multi_reduction <add>, %114, %cst_71 [1, 2] : vector<1x32x32xf32> to vector<1xf32>
    %116 = vector.shape_cast %115 : vector<1xf32> to vector<1x1x1xf32>
    %117 = vector.extract %116[0, 0, 0] : f32 from vector<1x1x1xf32>
    %cst_72 = arith.constant 0.000000e+00 : f32
    %118 = vector.broadcast %cst_72 : f32 to vector<32x32xf32>
    %119 = arith.select %20, %111, %118 : vector<32x32xi1>, vector<32x32xf32>
    %120 = vector.shape_cast %119 : vector<32x32xf32> to vector<1x32x32xf32>
    %cst_73 = arith.constant dense<0.000000e+00> : vector<1xf32>
    %121 = vector.multi_reduction <add>, %120, %cst_73 [1, 2] : vector<1x32x32xf32> to vector<1xf32>
    %122 = vector.shape_cast %121 : vector<1xf32> to vector<1x1x1xf32>
    %123 = vector.extract %122[0, 0, 0] : f32 from vector<1x1x1xf32>
    %cst_74 = arith.constant 1.000000e+00 : f32
    %124 = vector.broadcast %cst_74 : f32 to vector<32x32xf32>
    %125 = arith.cmpf olt, %111, %124 : vector<32x32xf32>
    %126 = arith.andi %20, %125 : vector<32x32xi1>
    %cst_75 = arith.constant 1.000000e+00 : f32
    %cst_76 = arith.constant 0.000000e+00 : f32
    %127 = vector.broadcast %cst_75 : f32 to vector<32x32xf32>
    %128 = vector.broadcast %cst_76 : f32 to vector<32x32xf32>
    %129 = arith.select %126, %127, %128 : vector<32x32xi1>, vector<32x32xf32>
    %130 = vector.shape_cast %129 : vector<32x32xf32> to vector<1x32x32xf32>
    %cst_77 = arith.constant dense<0.000000e+00> : vector<1xf32>
    %131 = vector.multi_reduction <add>, %130, %cst_77 [1, 2] : vector<1x32x32xf32> to vector<1xf32>
    %132 = vector.shape_cast %131 : vector<1xf32> to vector<1x1x1xf32>
    %133 = vector.extract %132[0, 0, 0] : f32 from vector<1x1x1xf32>
    %cst_78 = arith.constant 3.000000e+00 : f32
    %134 = vector.broadcast %cst_78 : f32 to vector<32x32xf32>
    %135 = arith.cmpf olt, %111, %134 : vector<32x32xf32>
    %136 = arith.andi %20, %135 : vector<32x32xi1>
    %cst_79 = arith.constant 1.000000e+00 : f32
    %cst_80 = arith.constant 0.000000e+00 : f32
    %137 = vector.broadcast %cst_79 : f32 to vector<32x32xf32>
    %138 = vector.broadcast %cst_80 : f32 to vector<32x32xf32>
    %139 = arith.select %136, %137, %138 : vector<32x32xi1>, vector<32x32xf32>
    %140 = vector.shape_cast %139 : vector<32x32xf32> to vector<1x32x32xf32>
    %cst_81 = arith.constant dense<0.000000e+00> : vector<1xf32>
    %141 = vector.multi_reduction <add>, %140, %cst_81 [1, 2] : vector<1x32x32xf32> to vector<1xf32>
    %142 = vector.shape_cast %141 : vector<1xf32> to vector<1x1x1xf32>
    %143 = vector.extract %142[0, 0, 0] : f32 from vector<1x1x1xf32>
    %cst_82 = arith.constant 5.000000e+00 : f32
    %144 = vector.broadcast %cst_82 : f32 to vector<32x32xf32>
    %145 = arith.cmpf olt, %111, %144 : vector<32x32xf32>
    %146 = arith.andi %20, %145 : vector<32x32xi1>
    %cst_83 = arith.constant 1.000000e+00 : f32
    %cst_84 = arith.constant 0.000000e+00 : f32
    %147 = vector.broadcast %cst_83 : f32 to vector<32x32xf32>
    %148 = vector.broadcast %cst_84 : f32 to vector<32x32xf32>
    %149 = arith.select %146, %147, %148 : vector<32x32xi1>, vector<32x32xf32>
    %150 = vector.shape_cast %149 : vector<32x32xf32> to vector<1x32x32xf32>
    %cst_85 = arith.constant dense<0.000000e+00> : vector<1xf32>
    %151 = vector.multi_reduction <add>, %150, %cst_85 [1, 2] : vector<1x32x32xf32> to vector<1xf32>
    %152 = vector.shape_cast %151 : vector<1xf32> to vector<1x1x1xf32>
    %153 = vector.extract %152[0, 0, 0] : f32 from vector<1x1x1xf32>
    %154 = tpu.iota {dimensions = array<i32: 0>} : vector<8x128xi32>
    %155 = tpu.iota {dimensions = array<i32: 1>} : vector<8x128xi32>
    %c0_i32 = arith.constant 0 : i32
    %156 = vector.broadcast %c0_i32 : i32 to vector<8x128xi32>
    %157 = arith.cmpi eq, %154, %156 : vector<8x128xi32>
    %cst_86 = arith.constant 0.000000e+00 : f32
    %158 = vector.broadcast %cst_86 : f32 to vector<8x128xf32>
    %c0_i32_87 = arith.constant 0 : i32
    %159 = vector.broadcast %c0_i32_87 : i32 to vector<8x128xi32>
    %160 = arith.cmpi eq, %155, %159 : vector<8x128xi32>
    %161 = arith.andi %157, %160 : vector<8x128xi1>
    %162 = vector.broadcast %49 : f32 to vector<8x128xf32>
    %163 = arith.select %161, %162, %158 : vector<8x128xi1>, vector<8x128xf32>
    %c1_i32 = arith.constant 1 : i32
    %164 = vector.broadcast %c1_i32 : i32 to vector<8x128xi32>
    %165 = arith.cmpi eq, %155, %164 : vector<8x128xi32>
    %166 = arith.andi %157, %165 : vector<8x128xi1>
    %167 = vector.broadcast %78 : f32 to vector<8x128xf32>
    %168 = arith.select %166, %167, %163 : vector<8x128xi1>, vector<8x128xf32>
    %c2_i32 = arith.constant 2 : i32
    %169 = vector.broadcast %c2_i32 : i32 to vector<8x128xi32>
    %170 = arith.cmpi eq, %155, %169 : vector<8x128xi32>
    %171 = arith.andi %157, %170 : vector<8x128xi1>
    %172 = vector.broadcast %107 : f32 to vector<8x128xf32>
    %173 = arith.select %171, %172, %168 : vector<8x128xi1>, vector<8x128xf32>
    %c3_i32 = arith.constant 3 : i32
    %174 = vector.broadcast %c3_i32 : i32 to vector<8x128xi32>
    %175 = arith.cmpi eq, %155, %174 : vector<8x128xi32>
    %176 = arith.andi %157, %175 : vector<8x128xi1>
    %177 = vector.broadcast %117 : f32 to vector<8x128xf32>
    %178 = arith.select %176, %177, %173 : vector<8x128xi1>, vector<8x128xf32>
    %c4_i32 = arith.constant 4 : i32
    %179 = vector.broadcast %c4_i32 : i32 to vector<8x128xi32>
    %180 = arith.cmpi eq, %155, %179 : vector<8x128xi32>
    %181 = arith.andi %157, %180 : vector<8x128xi1>
    %182 = vector.broadcast %123 : f32 to vector<8x128xf32>
    %183 = arith.select %181, %182, %178 : vector<8x128xi1>, vector<8x128xf32>
    %c5_i32 = arith.constant 5 : i32
    %184 = vector.broadcast %c5_i32 : i32 to vector<8x128xi32>
    %185 = arith.cmpi eq, %155, %184 : vector<8x128xi32>
    %186 = arith.andi %157, %185 : vector<8x128xi1>
    %187 = vector.broadcast %133 : f32 to vector<8x128xf32>
    %188 = arith.select %186, %187, %183 : vector<8x128xi1>, vector<8x128xf32>
    %c6_i32 = arith.constant 6 : i32
    %189 = vector.broadcast %c6_i32 : i32 to vector<8x128xi32>
    %190 = arith.cmpi eq, %155, %189 : vector<8x128xi32>
    %191 = arith.andi %157, %190 : vector<8x128xi1>
    %192 = vector.broadcast %143 : f32 to vector<8x128xf32>
    %193 = arith.select %191, %192, %188 : vector<8x128xi1>, vector<8x128xf32>
    %c7_i32 = arith.constant 7 : i32
    %194 = vector.broadcast %c7_i32 : i32 to vector<8x128xi32>
    %195 = arith.cmpi eq, %155, %194 : vector<8x128xi32>
    %196 = arith.andi %157, %195 : vector<8x128xi1>
    %197 = vector.broadcast %153 : f32 to vector<8x128xf32>
    %198 = arith.select %196, %197, %193 : vector<8x128xi1>, vector<8x128xf32>
    %c0_88 = arith.constant 0 : index
    %c0_89 = arith.constant 0 : index
    %c0_90 = arith.constant 0 : index
    %c0_91 = arith.constant 0 : index
    %199 = vector.load %arg10[%c0_88, %c0_89, %c0_90, %c0_91] : memref<1x1x8x128xf32, #tpu.memory_space<vmem>>, vector<1x1x8x128xf32>
    %200 = vector.shape_cast %199 : vector<1x1x8x128xf32> to vector<8x128xf32>
    %201 = vector.shape_cast %198 : vector<8x128xf32> to vector<1x1x8x128xf32>
    tpu.vector_store %arg10[%c0_88, %c0_89, %c0_90, %c0_91], %201 {strides = array<i32>} : memref<1x1x8x128xf32, #tpu.memory_space<vmem>>, vector<1x1x8x128xf32>,
    return
  }
  func.func @transform_0(%arg0: i32, %arg1: i32) -> (i32, i32, i32, i32) {
    %c0_i32 = arith.constant 0 : i32
    %c0_i32_0 = arith.constant 0 : i32
    %c0_i32_1 = arith.constant 0 : i32
    return %arg0, %c0_i32, %arg1, %c0_i32_0 : i32, i32, i32, i32
  }
  func.func @transform_1(%arg0: i32, %arg1: i32) -> (i32, i32, i32) {
    %c0_i32 = arith.constant 0 : i32
    %c0_i32_0 = arith.constant 0 : i32
    return %arg0, %arg1, %c0_i32 : i32, i32, i32
  }
  func.func @transform_2(%arg0: i32, %arg1: i32) -> (i32, i32, i32, i32) {
    %c0_i32 = arith.constant 0 : i32
    %c0_i32_0 = arith.constant 0 : i32
    %c0_i32_1 = arith.constant 0 : i32
    return %arg0, %c0_i32, %arg1, %c0_i32_0 : i32, i32, i32, i32
  }
  func.func @transform_3(%arg0: i32, %arg1: i32) -> (i32, i32, i32, i32) {
    %c0_i32 = arith.constant 0 : i32
    %c0_i32_0 = arith.constant 0 : i32
    %c0_i32_1 = arith.constant 0 : i32
    return %arg0, %c0_i32, %arg1, %c0_i32_0 : i32, i32, i32, i32
  }
  func.func @transform_4(%arg0: i32, %arg1: i32) -> (i32, i32, i32, i32) {
    %c0_i32 = arith.constant 0 : i32
    %c0_i32_0 = arith.constant 0 : i32
    %c0_i32_1 = arith.constant 0 : i32
    return %arg0, %c0_i32, %arg1, %c0_i32_0 : i32, i32, i32, i32
  }
  func.func @transform_5(%arg0: i32, %arg1: i32) -> (i32, i32, i32, i32) {
    %c0_i32 = arith.constant 0 : i32
    %c0_i32_0 = arith.constant 0 : i32
    %c0_i32_1 = arith.constant 0 : i32
    return %arg0, %c0_i32, %arg1, %c0_i32_0 : i32, i32, i32, i32
  }
  func.func @transform_6(%arg0: i32, %arg1: i32) -> (i32, i32, i32, i32) {
    %c0_i32 = arith.constant 0 : i32
    %c0_i32_0 = arith.constant 0 : i32
    %c0_i32_1 = arith.constant 0 : i32
    return %arg0, %c0_i32, %arg1, %c0_i32_0 : i32, i32, i32, i32
  }
  func.func @transform_7(%arg0: i32, %arg1: i32) -> (i32, i32, i32, i32) {
    %c0_i32 = arith.constant 0 : i32
    %c0_i32_0 = arith.constant 0 : i32
    %c0_i32_1 = arith.constant 0 : i32
    return %arg0, %c0_i32, %arg1, %c0_i32_0 : i32, i32, i32, i32
  }
  func.func @transform_8(%arg0: i32, %arg1: i32) -> (i32, i32, i32, i32) {
    %c0_i32 = arith.constant 0 : i32
    %c0_i32_0 = arith.constant 0 : i32
    %c0_i32_1 = arith.constant 0 : i32
    return %arg0, %arg1, %c0_i32, %c0_i32_0 : i32, i32, i32, i32
  }
}

</mosaic_0001>

<bundles_post_ra>
// kernel: tpu_custom_call.1
= control target key start
LH: loop header
LB: loop body
LE: loop exit
PB: predicated region body
PF: predicated region fallthrough
CT: control target
= control target key end

     0   :  { %s2886_s0 = inlined_call_operand.hbm [shape: f32[2,2,32,32], index: 0, kind: input, shape index: {}]   ;;  %s2887_s1 = inlined_call_operand.hbm [shape: f32[2,32,32], index: 1, kind: input, shape index: {}]   ;;  %s2888_s2 = inlined_call_operand.hbm [shape: f32[2,2,32,32], index: 2, kind: input, shape index: {}]   ;;  %s2889_s3 = inlined_call_operand.hbm [shape: f32[2,2,32,32], index: 3, kind: input, shape index: {}]   ;;  %s2890_s4 = inlined_call_operand.hbm [shape: f32[2,2,32,32], index: 4, kind: input, shape index: {}]   ;;  %s2891_s5 = inlined_call_operand.hbm [shape: f32[2,2,32,32], index: 5, kind: input, shape index: {}]   ;;  %s2892_s6 = inlined_call_operand.hbm [shape: f32[2,2,32,32], index: 6, kind: input, shape index: {}]   ;;  %s2893_s7 = inlined_call_operand.hbm [shape: f32[2,2,32,32], index: 7, kind: input, shape index: {}]   ;;  %s2894_s8 = inlined_call_operand.hbm [shape: f32[2,1,8,128], index: 8, kind: output, shape index: {}]  }
   0x1   :  { %2909 = sst [smem:[#allocation33_spill]] %s2887_s1 }
   0x2   :  { %2910 = sst [smem:[#allocation34_spill]] %s2889_s3 }
   0x3   :  { %2911 = sst [smem:[#allocation35_spill]] %s2891_s5 }
   0x4   :  { %2912 = sst [smem:[#allocation36_spill]] %s2894_s8 }
   0x5   :  { %13 = vsyncpa [#allocation3], 0 }
   0x6   :  { %15 = vsyncpa [#allocation3 + $0x1], 0 }
   0x7   :  { %16 = vsyncpa [#allocation6], 0 }
   0x8   :  { %18 = vsyncpa [#allocation6 + $0x1], 0 }
   0x9   :  { %19 = vsyncpa [#allocation9], 0 }
   0xa   :  { %21 = vsyncpa [#allocation9 + $0x1], 0 }
   0xb   :  { %22 = vsyncpa [#allocation12], 0 }
   0xc   :  { %24 = vsyncpa [#allocation12 + $0x1], 0 }
   0xd   :  { %25 = vsyncpa [#allocation15], 0 }
   0xe   :  { %27 = vsyncpa [#allocation15 + $0x1], 0 }
   0xf   :  { %28 = vsyncpa [#allocation4], 0 }
  0x10   :  { %30 = vsyncpa [#allocation4 + $0x1], 0  ;;  %s2107_s27 = smov 0   ;;  %s2109_s28 = smov 0  }
  0x11   :  { %s2111_s29 = smov 0   ;;  %s2113_s30 = smov 0  }
  0x12   :  { %s2115_s9 = smov 0   ;;  %s2117_s10 = smov 0  }
  0x13 LB: > { %2913 = sst [smem:[#allocation23_spill]] %s2028_s27  ;;  %s2138_s11 = sadd.s32 4294967295, %s2048_s10   ;;  %s2048_s10 = sphi %s2117_s10, %s36_s10   ;;  %s2044_s9 = sphi %s2115_s9, %s2957_s9   ;;  %s2040_s30 = sphi %s2113_s30, %s2956_s30   ;;  %s2036_s29 = sphi %s2111_s29, %s2955_s29   ;;  %s2032_s28 = sphi %s2109_s28, %s2959_s28   ;;  %s2028_s27 = sphi %s2107_s27, %s2958_s27  }
  0x14   : > { %2914 = sst [smem:[#allocation24_spill]] %s2036_s29  ;;  %s1475_s12 = sadd.s32 4294967294, %s2048_s10  }
  0x15   : > { %2915 = sst [smem:[#allocation25_spill]] %s2040_s30  ;;  %s48_s13 = sadd.s32 1, %s2044_s9 }
  0x16   : > { %2916 = sst [smem:[#allocation26_spill]] %s2044_s9  ;;  %s57_s14 = sadd.s32 1, %s2036_s29 }
  0x17   : > { %2917 = sst [smem:[#allocation27_spill]] %s2048_s10  ;;  %p50_p0 = scmp.ge.s32.totalorder %s48_s13, 2 }
  0x18   : > { %2918 = sst [smem:[#allocation28_spill]] %s2138_s11  ;;  %p64_p1 = scmp.ne.s32.totalorder %s2036_s29, %s2032_s28 }
  0x19   : > { %p65_p2 = scmp.eq.s32.totalorder %s2048_s10, 0  ;;  %p70_p3 = scmp.ne.s32.totalorder %s2032_s28, %s2028_s27 }
  0x1a   : > { %s2961_s13 = smov (%p50_p0, %s48_s13), 0  ;;  %p71_p5 = scmp.eq.s32.totalorder %s2138_s11, 0 }
  0x1b   : > { %2919 = sst [smem:[#allocation29_spill]] %s2961_s13  ;;  %p2150_p4 = por %p65_p2, %p64_p1 }
  0x1c   : > { %s52_s16 = ssub.s32 %s2044_s9, %s2961_s13  ;;  %p292_p6 = scmp.eq.s32.totalorder %s2138_s11, 1 }
  0x1d   : > { %p55_p7 = scmp.eq.s32.totalorder %s52_s16, 0  ;;  %p2158_p8 = por %p71_p5, %p70_p3 }
  0x1e   : > { %p2162_p9 = por %p292_p6, %p64_p1  ;;  %p298_p10 = scmp.eq.s32.totalorder %s1475_s12, 1 }
  0x1f   : > { %s2167_s19 = scalar_select %p55_p7, %s2036_s29, %s57_s14  }
  0x20   : > { %s2922_s18 = scalar_select %p2162_p9, 1, 0 }
  0x21   : > { %2924 = sst [smem:[#allocation31_spill]] %s2167_s19  ;;  %p2169_p11 = por %p298_p10, %p70_p3 }
  0x22   : > { %2923 = sst [smem:[#allocation30_spill]] %s2922_s18  ;;  %p1619_p13 = scmp.lt.s32.totalorder %s2048_s10, 2 }
  0x23   : > { %s2925_s20 = scalar_select %p2169_p11, 1, 0 }
  0x24   : > { %s2176_s21 = sand.u32 1, %s2036_s29   ;;  %s2182_s23 = sshll.u32 %s2044_s9, 10 }
  0x25   : > { %2926 = sst [smem:[#allocation32_spill]] %s2925_s20  ;;  %s2179_s22 = sshll.u32 %s2176_s21, 6 }
  0x26   : > { %p2186_p0 = pnand %p1619_p13, %p2150_p4  ;;  %s2191_s25 = sand.u32 1, %s2048_s10  }
  0x27   : > { %s1481_s26 = sshll.u32 %s2176_s21, 5  ;;  %s1549_s12 = sshll.u32 %s2044_s9, 9 }
  0x28   : > { %s2928_s1 = sld [smem:[#allocation33_spill]]  ;;  %s345_s19 = scalar_lea.vmem [#allocation5], %s1481_s26 }
  0x29   : > { %s354_s29 = sshll.u32 %s345_s19, 4  ;;  %p1502_p1 = scmp.ge.s32.totalorder %s2048_s10, 1  ;;  %s355_s29 = int_to_ptr.vmem [resolvable:$true] %s354_s29 }
  0x2a   : > { %p500_p2 = scmp.lt.s32.totalorder %s2048_s10, 3  ;;  %s2903_s15 = scalar_lea.sflag [#allocation6], %s2191_s25 }
  0x2b   : > { %p2203_p3 = pneg %p2186_p0  ;;  %s1741_s27 = scalar_lea.vmem %s355_s29, 512 }
  0x2c   : > { %p1742_p4 = scmp.ne.s32.totalorder %s355_s29, %s1741_s27  ;;  %s2050_s9 = smov [#allocation5]  }
  0x2d   : > { %s1746_s14 = sshll.u32 %s2050_s9, 4  ;;  %s1747_s14 = int_to_ptr.vmem [resolvable:$false] %s1746_s14 }
  0x2e   : > { %s353_s13 = scalar_lea.hbm %s2928_s1, %s1549_s12  ;;  %p1744_p5 = pnand %p1742_p4, %p2203_p3 }
  0x2f   : > { %s1748_s26 = scalar_lea.vmem %s1747_s14, 1024  ;;  %p1749_p7 = scmp.lt.s32.totalorder %s355_s29, %s1747_s14 }
  0x30   : > { %p1745_p6 = pneg %p1744_p5  ;;  %p1750_p10 = scmp.lt.s32.totalorder %s1748_s26, %s1741_s27 }
  0x32   : > { %p1751_p13 = por %p1750_p10, %p1749_p7 }
  0x34   : > { %p1752_p12 = pnand %p1751_p13, %p1745_p6 }
  0x36   : > { %1755 = shalt.err (!%p1752_p12)
}
  0x37   : > { %s2051_s19 = smov 128   ;;  %s2052_s12 = smov 8  }
  0x38   : > { %1596 = dma.hbm_to_vmem [thread:$0]  (!%p2186_p0), %s353_s13, 512, %s355_s29, %s2903_s15, %s2051_s19, %s2051_s19, %s2052_s12  }
  0x39   : > { %p2220_p4 = pnand %p1502_p1, %p500_p2  ;;  %s2931_s3 = sld [smem:[#allocation34_spill]] }
  0x3a   : > { %s391_s26 = scalar_lea.vmem [#allocation8], %s2179_s22  ;;  %s2906_s8 = scalar_lea.sflag [#allocation9], %s2191_s25 }
  0x3b   : > { %s400_s1 = sshll.u32 %s391_s26, 4  ;;  %s2053_s29 = smov [#allocation8]   ;;  %s401_s1 = int_to_ptr.vmem [resolvable:$true] %s400_s1 }
  0x3c   : > { %s1769_s18 = scalar_lea.vmem %s401_s1, 1024  ;;  %s1774_s13 = sshll.u32 %s2053_s29, 4  ;;  %s1775_s13 = int_to_ptr.vmem [resolvable:$false] %s1774_s13 }
  0x3d   : > { %p1770_p12 = scmp.ne.s32.totalorder %s401_s1, %s1769_s18  ;;  %s1776_s15 = scalar_lea.vmem %s1775_s13, 2048 }
  0x3e   : > { %p1777_p1 = scmp.lt.s32.totalorder %s401_s1, %s1775_s13  ;;  %p1778_p2 = scmp.lt.s32.totalorder %s1776_s15, %s1769_s18 }
  0x3f   : > { %s399_s14 = scalar_lea.hbm %s2931_s3, %s2182_s23  ;;  %p1772_p5 = pnand %p1770_p12, %p2203_p3 }
  0x40   : > { %p1779_p7 = por %p1778_p2, %p1777_p1 }
  0x41   : > { %p1773_p6 = pneg %p1772_p5 }
  0x43   : > { %p1780_p10 = pnand %p1779_p7, %p1773_p6 }
  0x45   : > { %1783 = shalt.err (!%p1780_p10)
}
  0x46   : > { %1602 = dma.hbm_to_vmem [thread:$0]  (!%p2186_p0), %s399_s14, 1024, %s401_s1, %s2906_s8, %s2051_s19, %s2051_s19, %s2052_s12  }
  0x47   : > { %s2932_s5 = sld [smem:[#allocation35_spill]]  ;;  %s437_s18 = scalar_lea.vmem [#allocation11], %s2179_s22 }
  0x48   : > { %s446_s15 = sshll.u32 %s437_s18, 4  ;;  %s434_s29 = scalar_lea.sflag [#allocation12], %s2191_s25  ;;  %s447_s15 = int_to_ptr.vmem [resolvable:$true] %s446_s15 }
  0x49   : > { %s1797_s13 = scalar_lea.vmem %s447_s15, 1024  ;;  %s2054_s3 = smov [#allocation11]  }
  0x4a   : > { %p1798_p13 = scmp.ne.s32.totalorder %s447_s15, %s1797_s13  ;;  %s1802_s10 = sshll.u32 %s2054_s3, 4  ;;  %s1803_s10 = int_to_ptr.vmem [resolvable:$false] %s1802_s10 }
  0x4b   : > { %s1804_s30 = scalar_lea.vmem %s1803_s10, 2048  ;;  %p1805_p6 = scmp.lt.s32.totalorder %s447_s15, %s1803_s10 }
  0x4c   : > { %p1800_p12 = pnand %p1798_p13, %p2203_p3  ;;  %p1806_p1 = scmp.lt.s32.totalorder %s1804_s30, %s1797_s13 }
  0x4d   : > { %s445_s26 = scalar_lea.hbm %s2932_s5, %s2182_s23 }
  0x4e   : > { %p1801_p5 = pneg %p1800_p12  ;;  %p1807_p2 = por %p1806_p1, %p1805_p6 }
  0x50   : > { %p1808_p7 = pnand %p1807_p2, %p1801_p5 }
  0x52   : > { %1811 = shalt.err (!%p1808_p7)
}
  0x53   : > { %1608 = dma.hbm_to_vmem [thread:$0]  (!%p2186_p0), %s445_s26, 1024, %s447_s15, %s434_s29, %s2051_s19, %s2051_s19, %s2052_s12  }
  0x54   : > { %s330_s30 = scalar_lea.hbm %s2886_s0, %s2182_s23  ;;  %s322_s10 = scalar_lea.vmem [#allocation2], %s2179_s22 }
  0x55   : > { %s331_s14 = sshll.u32 %s322_s10, 4  ;;  %s376_s18 = scalar_lea.hbm %s2888_s2, %s2182_s23  ;;  %s332_s14 = int_to_ptr.vmem [resolvable:$true] %s331_s14 }
  0x56   : > { %s319_s13 = scalar_lea.sflag [#allocation3], %s2176_s21  ;;  %s1825_s8 = scalar_lea.vmem %s332_s14, 1024 }
  0x57   : > { %p1826_p10 = scmp.ne.s32.totalorder %s332_s14, %s1825_s8  ;;  %s2055_s5 = smov [#allocation2]  }
  0x58   : > { %s1830_s11 = sshll.u32 %s2055_s5, 4  ;;  %s1831_s11 = int_to_ptr.vmem [resolvable:$false] %s1830_s11 }
  0x59   : > { %p1828_p13 = pnand %p1826_p10, %p2203_p3  ;;  %s1832_s26 = scalar_lea.vmem %s1831_s11, 2048 }
  0x5a   : > { %p1833_p5 = scmp.lt.s32.totalorder %s332_s14, %s1831_s11  ;;  %p1834_p6 = scmp.lt.s32.totalorder %s1832_s26, %s1825_s8 }
  0x5b   : > { %p1829_p12 = pneg %p1828_p13 }
  0x5c   : > { %p1835_p1 = por %p1834_p6, %p1833_p5 }
  0x5e   : > { %p1836_p2 = pnand %p1835_p1, %p1829_p12 }
  0x60   : > { %1839 = shalt.err (!%p1836_p2)
}
  0x61   : > { %1593 = dma.hbm_to_vmem [thread:$0]  (!%p2186_p0), %s330_s30, 1024, %s332_s14, %s319_s13, %s2051_s19, %s2051_s19, %s2052_s12  }
  0x62   : > { %s368_s15 = scalar_lea.vmem [#allocation7], %s2179_s22  ;;  %s422_s11 = scalar_lea.hbm %s2890_s4, %s2182_s23 }
  0x63   : > { %s377_s1 = sshll.u32 %s368_s15, 4  ;;  %s2056_s10 = smov [#allocation7]   ;;  %s378_s1 = int_to_ptr.vmem [resolvable:$true] %s377_s1 }
  0x64   : > { %s1853_s8 = scalar_lea.vmem %s378_s1, 1024  ;;  %s1858_s9 = sshll.u32 %s2056_s10, 4  ;;  %s1859_s9 = int_to_ptr.vmem [resolvable:$false] %s1858_s9 }
  0x65   : > { %p1854_p7 = scmp.ne.s32.totalorder %s378_s1, %s1853_s8  ;;  %s1860_s16 = scalar_lea.vmem %s1859_s9, 2048 }
  0x66   : > { %p1861_p12 = scmp.lt.s32.totalorder %s378_s1, %s1859_s9  ;;  %p1862_p5 = scmp.lt.s32.totalorder %s1860_s16, %s1853_s8 }
  0x67   : > { %p1856_p10 = pnand %p1854_p7, %p2203_p3 }
  0x68   : > { %p1863_p6 = por %p1862_p5, %p1861_p12 }
  0x69   : > { %p1857_p13 = pneg %p1856_p10 }
  0x6b   : > { %p1864_p1 = pnand %p1863_p6, %p1857_p13 }
  0x6d   : > { %1867 = shalt.err (!%p1864_p1)
}
  0x6e   : > { %s2933_s30 = scalar_lea.sflag [#allocation6], %s2191_s25  ;;  %s414_s26 = scalar_lea.vmem [#allocation10], %s2179_s22 }
  0x6f   : > { %1599 = dma.hbm_to_vmem [thread:$0]  (!%p2186_p0), %s376_s18, 1024, %s378_s1, %s2933_s30, %s2051_s19, %s2051_s19, %s2052_s12  }
  0x70   : > { %s423_s15 = sshll.u32 %s414_s26, 4  ;;  %s468_s8 = scalar_lea.hbm %s2892_s6, %s2182_s23  ;;  %s424_s15 = int_to_ptr.vmem [resolvable:$true] %s423_s15 }
  0x71   : > { %s1881_s10 = scalar_lea.vmem %s424_s15, 1024  ;;  %s2057_s9 = smov [#allocation10]  }
  0x72   : > { %p1882_p2 = scmp.ne.s32.totalorder %s424_s15, %s1881_s10  ;;  %s1886_s16 = sshll.u32 %s2057_s9, 4  ;;  %s1887_s16 = int_to_ptr.vmem [resolvable:$false] %s1886_s16 }
  0x73   : > { %s1888_s14 = scalar_lea.vmem %s1887_s16, 2048  ;;  %p1889_p13 = scmp.lt.s32.totalorder %s424_s15, %s1887_s16 }
  0x74   : > { %p1884_p7 = pnand %p1882_p2, %p2203_p3  ;;  %p1890_p12 = scmp.lt.s32.totalorder %s1888_s14, %s1881_s10 }
  0x76   : > { %p1885_p10 = pneg %p1884_p7  ;;  %p1891_p5 = por %p1890_p12, %p1889_p13 }
  0x78   : > { %p1892_p6 = pnand %p1891_p5, %p1885_p10 }
  0x7a   : > { %1895 = shalt.err (!%p1892_p6)
}
  0x7b   : > { %s2934_s18 = scalar_lea.sflag [#allocation9], %s2191_s25  ;;  %s460_s13 = scalar_lea.vmem [#allocation13], %s2179_s22 }
  0x7c   : > { %1605 = dma.hbm_to_vmem [thread:$0]  (!%p2186_p0), %s422_s11, 1024, %s424_s15, %s2934_s18, %s2051_s19, %s2051_s19, %s2052_s12  }
  0x7d   : > { %s469_s26 = sshll.u32 %s460_s13, 4  ;;  %s2058_s3 = smov [#allocation13]   ;;  %s470_s26 = int_to_ptr.vmem [resolvable:$true] %s469_s26 }
  0x7e   : > { %s1909_s5 = scalar_lea.vmem %s470_s26, 1024  ;;  %s1914_s10 = sshll.u32 %s2058_s3, 4  ;;  %s1915_s10 = int_to_ptr.vmem [resolvable:$false] %s1914_s10 }
  0x7f   : > { %p1910_p1 = scmp.ne.s32.totalorder %s470_s26, %s1909_s5  ;;  %s1916_s9 = scalar_lea.vmem %s1915_s10, 2048 }
  0x80   : > { %p1917_p10 = scmp.lt.s32.totalorder %s470_s26, %s1915_s10  ;;  %p1918_p13 = scmp.lt.s32.totalorder %s1916_s9, %s1909_s5 }
  0x81   : > { %p1912_p2 = pnand %p1910_p1, %p2203_p3 }
  0x82   : > { %p1919_p12 = por %p1918_p13, %p1917_p10 }
  0x83   : > { %p1913_p7 = pneg %p1912_p2 }
  0x85   : > { %p1920_p5 = pnand %p1919_p12, %p1913_p7 }
  0x87   : > { %1923 = shalt.err (!%p1920_p5)
}
  0x88   : > { %1611 = dma.hbm_to_vmem [thread:$0]  (!%p2186_p0), %s468_s8, 1024, %s470_s26, %s434_s29, %s2051_s19, %s2051_s19, %s2052_s12  }
  0x89   : > { %s491_s18 = scalar_lea.hbm %s2893_s7, %s2182_s23  ;;  %s483_s1 = scalar_lea.vmem [#allocation14], %s2179_s22 }
  0x8a   : > { %s492_s30 = sshll.u32 %s483_s1, 4  ;;  %s480_s13 = scalar_lea.sflag [#allocation15], %s2176_s21  ;;  %s493_s30 = int_to_ptr.vmem [resolvable:$true] %s492_s30 }
  0x8b   : > { %s1937_s5 = scalar_lea.vmem %s493_s30, 1024  ;;  %s2059_s25 = smov [#allocation14]  }
  0x8c   : > { %p1938_p6 = scmp.ne.s32.totalorder %s493_s30, %s1937_s5  ;;  %s1942_s3 = sshll.u32 %s2059_s25, 4  ;;  %s1943_s3 = int_to_ptr.vmem [resolvable:$false] %s1942_s3 }
  0x8d   : > { %s1944_s10 = scalar_lea.vmem %s1943_s3, 2048  ;;  %p1945_p7 = scmp.lt.s32.totalorder %s493_s30, %s1943_s3 }
  0x8e   : > { %p1940_p1 = pnand %p1938_p6, %p2203_p3  ;;  %p1946_p10 = scmp.lt.s32.totalorder %s1944_s10, %s1937_s5 }
  0x90   : > { %p1941_p2 = pneg %p1940_p1  ;;  %p1947_p13 = por %p1946_p10, %p1945_p7 }
  0x92   : > { %p1948_p12 = pnand %p1947_p13, %p1941_p2 }
  0x94   : > { %1951 = shalt.err (!%p1948_p12)
}
  0x95   : > { %1614 = dma.hbm_to_vmem [thread:$0]  (!%p2186_p0), %s491_s18, 1024, %s493_s30, %s480_s13, %s2051_s19, %s2051_s19, %s2052_s12  }
  0x96   : > { %504 = sbr.rel (%p2220_p4) target bundleno = 496 (0x1f0), region = 52  ;;  %s2340_s20 = sand.u32 (!%p2220_p4), 1, %s2032_s28  }
  0x97   : > { %s1503_s21 = sshll.u32 (!%p2220_p4), %s2340_s20, 6  ;;  %s507_s22 = scalar_lea.sflag (!%p2220_p4), [#allocation3], %s2340_s20 }
  0x98   : > { %s2344_s23 = scalar_lea.vmem (!%p2220_p4), [#allocation2], %s1503_s21 }
  0x9b   : > { %2003 = dma.done.wait (%p2158_p8), %s507_s22, 1024  }
  0x9c   : > { %2005 = vsyncadd (%p2158_p8), %s507_s22, 4294966272  ;;  %s2935_s24 = sld [smem:[#allocation28_spill]]  ;;  %s1504_s12 = sshll.u32 %s2340_s20, 5 }
  0x9d   : > { %s2352_s29 = scalar_lea.vmem [#allocation5], %s1504_s12 }
  0xa2   : > { %s515_s19 = sand.u32 1, %s2935_s24  }
  0xa3   : > { %s516_s27 = scalar_lea.sflag [#allocation6], %s515_s19 }
  0xa4   : > { %2007 = dma.done.wait (%p2158_p8), %s516_s27, 1536  }
  0xa5   : > { %2009 = vsyncadd (%p2158_p8), %s516_s27, 4294965760  ;;  %s2358_s8 = scalar_lea.vmem [#allocation7], %s1503_s21  ;;  %s534_s26 = scalar_lea.sflag [#allocation9], %s515_s19 }
  0xa6   : > { %s2360_s9 = scalar_lea.vmem [#allocation8], %s1503_s21 }
  0xa7   : > { %2011 = dma.done.wait (%p2158_p8), %s534_s26, 2048  }
  0xa8   : > { %2013 = vsyncadd (%p2158_p8), %s534_s26, 4294965248  ;;  %s2366_s11 = scalar_lea.vmem [#allocation10], %s1503_s21  ;;  %s552_s15 = scalar_lea.sflag [#allocation12], %s515_s19 }
  0xa9   : > { %s2368_s16 = scalar_lea.vmem [#allocation11], %s1503_s21 }
  0xaa   : > { %2015 = dma.done.wait (%p2158_p8), %s552_s15, 2048  }
  0xab   : > { %2017 = vsyncadd (%p2158_p8), %s552_s15, 4294965248  ;;  %s2374_s14 = scalar_lea.vmem [#allocation13], %s1503_s21  ;;  %s570_s18 = scalar_lea.sflag [#allocation15], %s2340_s20 }
  0xac   : > { %s2377_s1 = scalar_lea.vmem [#allocation14], %s1503_s21 }
  0xad   : > { %2019 = dma.done.wait (%p2158_p8), %s570_s18, 1024  }
  0xae   : > { %2021 = vsyncadd (%p2158_p8), %s570_s18, 4294966272  ;;  %v2384_v0 = vld [vmem:[%s2344_s23] sm:$0xff]  ;;  %v2387_v1 = vld [vmem:[%s2344_s23 + $0x8] sm:$0xff]  ;;  %vm787_vm0 = vcmask 261120   ;;  %v2060_v38 = vmov 0.0   ;;  %s1511_s5 = sshll.u32 %s2340_s20, 3 }
  0xaf   : > { %v2390_v2 = vld [vmem:[%s2344_s23 + $0x10] sm:$0xff]  ;;  %v2393_v3 = vld [vmem:[%s2344_s23 + $0x18] sm:$0xff]  ;;  %v2396_v4 = vld [vmem:[%s2344_s23 + $0x20] sm:$0xff]  ;;  %v662_v6 = vmul.f32 %v2384_v0, %v2384_v0  ;;  %v663_v7 = vmul.f32 %v2387_v1, %v2387_v1  ;;  %s2947_s25 = sld [smem:[#allocation25_spill]] }
  0xb0   : > { %v2399_v5 = vld [vmem:[%s2344_s23 + $0x28] sm:$0xff]  ;;  %v664_v8 = vmul.f32 %v2390_v2, %v2390_v2  ;;  %v2408_v9 = vld [vmem:[%s2344_s23 + $0x30] sm:$0xff]  ;;  %v2411_v10 = vld [vmem:[%s2344_s23 + $0x38] sm:$0xff]  ;;  %v665_v12 = vmul.f32 %v2393_v3, %v2393_v3  ;;  %v666_v13 = vmul.f32 %v2396_v4, %v2396_v4  ;;  %s640_s23 = scalar_lea.vmem [#allocation16], %s1511_s5  ;;  %s2949_s26 = sld [smem:[#allocation36_spill]] }
  0xb1   : > { %v658_v11 = vld [vmem:[%s2352_s29] sm:$0xff]  ;;  %v667_v14 = vmul.f32 %v2399_v5, %v2399_v5  ;;  %v659_v15 = vld [vmem:[%s2352_s29 + $0x8] sm:$0xff]  ;;  %v660_v16 = vld [vmem:[%s2352_s29 + $0x10] sm:$0xff]  ;;  %v668_v18 = vmul.f32 %v2408_v9, %v2408_v9  ;;  %v669_v19 = vmul.f32 %v2411_v10, %v2411_v10  ;;  %s1219_s19 = sshll.u32 %s640_s23, 4  ;;  %s1220_s19 = int_to_ptr.vmem [resolvable:$true] %s1219_s19 }
  0xb2   : > { %v661_v17 = vld [vmem:[%s2352_s29 + $0x18] sm:$0xff]  ;;  %v670_v20 = vadd.f32 %v666_v13, %v662_v6  ;;  %vm685_vm1 = vcmp.ge.f32.partialorder %v658_v11, 0.5  ;;  %v902_v22 = vld [vmem:[%s2374_s14] sm:$0xff]  ;;  %v903_v23 = vld [vmem:[%s2374_s14 + $0x8] sm:$0xff]  ;;  %vm686_vm2 = vcmp.ge.f32.partialorder %v659_v15, 0.5  ;;  %vm687_vm3 = vcmp.ge.f32.partialorder %v660_v16, 0.5 }
  0xb3   : > { %v671_v21 = vadd.f32 %v667_v14, %v663_v7  ;;  %v672_v24 = vadd.f32 %v668_v18, %v664_v8  ;;  %v673_v25 = vadd.f32 %v669_v19, %v665_v12  ;;  %v904_v26 = vld [vmem:[%s2374_s14 + $0x10] sm:$0xff]  ;;  %vm688_vm4 = vcmp.ge.f32.partialorder %v661_v17, 0.5  ;;  %v905_v27 = vld [vmem:[%s2374_s14 + $0x18] sm:$0xff]  ;;  %v1532_v28 = vld [vmem:[%s2374_s14 + $0x20] sm:$0xff]  ;;  %s1952_s15 = scalar_lea.vmem %s1220_s19, 128 }
  0xb4   : > { %vm689_vm5 = vcmp.lt.f32.partialorder %v670_v20, 160000.0  ;;  %v2433_v29 = vld [vmem:[%s2377_s1] sm:$0xff]  ;;  %v2436_v30 = vsub.f32 %v2384_v0, %v902_v22  ;;  %v1533_v32 = vld [vmem:[%s2374_s14 + $0x28] sm:$0xff]  ;;  %v913_v34 = vld [vmem:[%s2377_s1 + $0x10] sm:$0xff]  ;;  %v2448_v36 = vsub.f32 %v2387_v1, %v903_v23  ;;  %v2461_v44 = vsub.f32 %v2390_v2, %v904_v26  ;;  %p1953_p8 = scmp.ne.s32.totalorder %s1220_s19, %s1952_s15 }
  0xb5   : > { %vm690_vm6 = vcmp.lt.f32.partialorder %v671_v21, 160000.0  ;;  %vm691_vm7 = vcmp.lt.f32.partialorder %v672_v24, 160000.0  ;;  %vm692_vm8 = vcmp.lt.f32.partialorder %v673_v25, 160000.0  ;;  %vm2439_vm9 = vmand %vm685_vm1, %vm689_vm5  ;;  %v912_v33 = vld [vmem:[%s2377_s1 + $0x8] sm:$0xff]  ;;  %v915_v35 = vmax.f32 %v2433_v29, 0.0001 }
  0xb6   : > { %vm2451_vm10 = vmand %vm686_vm2, %vm690_vm6  ;;  %v1540_v39 = vsel %vm2439_vm9, 1.0, %v2060_v38  ;;  %v1534_v40 = vld [vmem:[%s2374_s14 + $0x30] sm:$0xff]  ;;  %v914_v41 = vld [vmem:[%s2377_s1 + $0x18] sm:$0xff]  ;;  %v916_v42 = vmax.f32 %v912_v33, 0.0001  ;;  %v2476_v51 = vsub.f32 %v2393_v3, %v905_v27  ;;  %v932_v58 = vsub.f32 %v2396_v4, %v1532_v28  ;;  %s1545_s22 = sshll.u32 %s2947_s25, 7  ;;  %p1954_p0 = pnand %p1953_p8, %p2162_p9 }
  0xb7   : > { %v917_v43 = vmax.f32 %v913_v34, 0.0001  ;;  %vm2465_vm11 = vmand %vm687_vm3, %vm691_vm7  ;;  %v1541_v46 = vsel %vm2451_vm10, 1.0, %v2060_v38  ;;  %v1048_v47 = vsel %vm787_vm0, %v1540_v39, 0.0  ;;  %v918_v48 = vmax.f32 %v914_v41, 0.0001 }
  0xb8   : > { %v1536_v49 = vld [vmem:[%s2377_s1 + $0x20] sm:$0xff]  ;;  %v1537_v50 = vld [vmem:[%s2377_s1 + $0x28] sm:$0xff]  ;;  %vm2480_vm12 = vmand %vm688_vm4, %vm692_vm8  ;;  %v1542_v53 = vsel %vm2465_vm11, 1.0, %v2060_v38  ;;  %v1049_v54 = vsel %vm787_vm0, %v1541_v46, 0.0  ;;  %v933_v11 = vsub.f32 %v2399_v5, %v1533_v32  ;;  %v934_v13 = vsub.f32 %v2408_v9, %v1534_v40  ;;  %p1955_p3 = pneg %p1954_p0 }
  0xb9   : > { %v1538_v55 = vld [vmem:[%s2377_s1 + $0x30] sm:$0xff]  ;;  %v1539_v56 = vld [vmem:[%s2377_s1 + $0x38] sm:$0xff]  ;;  %v924_v57 = vmax.f32 %v1536_v49, 0.0001  ;;  %v1543_v59 = vsel %vm2480_vm12, 1.0, %v2060_v38  ;;  %v1050_v60 = vadd.f32 %v1049_v54, %v1048_v47  ;;  %v1051_v61 = vsel %vm787_vm0, %v1542_v53, 0.0 }
  0xba   : > { %v1535_v62 = vld [vmem:[%s2374_s14 + $0x38] sm:$0xff]  ;;  %v925_v63 = vmax.f32 %v1537_v50, 0.0001  ;;  %v1053_v6 = vsel %vm787_vm0, %v1543_v59, 0.0  ;;  %v926_v7 = vmax.f32 %v1538_v55, 0.0001  ;;  %v1000_v46 = vmul.f32 %v2436_v30, %v2436_v30 }
  0xbb   : > { %v927_v8 = vmax.f32 %v1539_v56, 0.0001  ;;  %v1052_v12 = vadd.f32 %v1051_v61, %v1050_v60  ;;  %v936_v14 = vmul.f32 %v924_v57, %v915_v35  ;;  %v940_v15 = vand.u32 2147483647, %v2436_v30  ;;  %v2507_v47 = vld [vmem:[%s2360_s9] sm:$0xff]  ;;  %v707_v55 = vld [vmem:[%s2358_s8 + $0x10] sm:$0xff] }
  0xbc   : > { %v935_v16 = vsub.f32 %v2411_v10, %v1535_v62  ;;  %v937_v17 = vmul.f32 %v925_v63, %v916_v42  ;;  %v941_v18 = vand.u32 2147483647, %v2448_v36  ;;  %v942_v19 = vand.u32 2147483647, %v2461_v44  ;;  %v1520_v50 = vld [vmem:[%s2360_s9 + $0x20] sm:$0xff]  ;;  %v2526_v56 = vld [vmem:[%s2360_s9 + $0x8] sm:$0xff] }
  0xbd   : > { %v1054_v20 = vadd.f32 %v1053_v6, %v1052_v12  ;;  %v938_v21 = vmul.f32 %v926_v7, %v917_v43  ;;  %v943_v22 = vand.u32 2147483647, %v2476_v51  ;;  %v948_v23 = vand.u32 2147483647, %v932_v58  ;;  %v708_v60 = vld [vmem:[%s2358_s8 + $0x18] sm:$0xff]  ;;  %v2533_v61 = vld [vmem:[%s2360_s9 + $0x10] sm:$0xff] }
  0xbe   : > { %v939_v24 = vmul.f32 %v927_v8, %v918_v48  ;;  %v949_v25 = vand.u32 2147483647, %v933_v11  ;;  %v950_v26 = vand.u32 2147483647, %v934_v13  ;;  %v944_v27 = vmul.f32 %v940_v15, %v924_v57  ;;  %v1521_v57 = vld [vmem:[%s2360_s9 + $0x28] sm:$0xff]  ;;  %v2536_v62 = vld [vmem:[%s2360_s9 + $0x18] sm:$0xff] }
  0xbf   : > { %1055 = vadd.xlane.f32.xlu1 %v1054_v20  ;;  %v945_v28 = vmul.f32 %v941_v18, %v925_v63  ;;  %v951_v29 = vand.u32 2147483647, %v935_v16  ;;  %1672 = vrcp.f32 %v936_v14  ;;  %v946_v32 = vmul.f32 %v942_v19, %v926_v7  ;;  %v1516_v7 = vld [vmem:[%s2358_s8 + $0x20] sm:$0xff]  ;;  %v1523_v12 = vld [vmem:[%s2360_s9 + $0x38] sm:$0xff]  ;;  %v1518_v20 = vld [vmem:[%s2358_s8 + $0x30] sm:$0xff] }
  0xc0   : > { %v952_v33 = vmul.f32 %v948_v23, %v915_v35  ;;  %v953_v34 = vmul.f32 %v949_v25, %v916_v42  ;;  %1674 = vrcp.f32 %v937_v17  ;;  %v947_v39 = vmul.f32 %v943_v22, %v927_v8  ;;  %v1522_v8 = vld [vmem:[%s2360_s9 + $0x30] sm:$0xff]  ;;  %v1519_v23 = vld [vmem:[%s2358_s8 + $0x38] sm:$0xff]  ;;  %s2844_s9 = scalar_lea.hbm %s2949_s26, %s1545_s22 }
  0xc1   : > { %v954_v40 = vmul.f32 %v950_v26, %v917_v43  ;;  %v955_v41 = vmul.f32 %v951_v29, %v918_v48  ;;  %1676 = vrcp.f32 %v938_v21  ;;  %v1001_v42 = vmul.f32 %v2448_v36, %v2448_v36  ;;  %v705_v43 = vld [vmem:[%s2358_s8] sm:$0xff]  ;;  %v706_v48 = vld [vmem:[%s2358_s8 + $0x8] sm:$0xff] }
  0xc2   : > { %1678 = vrcp.f32 %v939_v24  ;;  %v2509_v49 = vadd.f32 %v952_v33, %v944_v27  ;;  %v2511_v35 = vadd.f32 %v953_v34, %v945_v28  ;;  %v1002_v54 = vmul.f32 %v2461_v44, %v2461_v44 }
  0xc3   : > { %1680 = vlog2.f32 %v936_v14  ;;  %v2518_v53 = vadd.f32 %v954_v40, %v946_v32  ;;  %v2520_v30 = vadd.f32 %v955_v41, %v947_v39  ;;  %v1003_v36 = vmul.f32 %v2476_v51, %v2476_v51  ;;  %v1517_v51 = vld [vmem:[%s2358_s8 + $0x28] sm:$0xff] }
  0xc4   : > { %1682 = vlog2.f32 %v937_v17  ;;  %v1004_v59 = vmul.f32 %v932_v58, %v932_v58  ;;  %v718_v63 = vmax.f32 %v2507_v47, 0.0001  ;;  %v1005_v6 = vmul.f32 %v933_v11, %v933_v11 }
  0xc5   : > { %1684 = vlog2.f32 %v938_v21  ;;  %v1006_v44 = vmul.f32 %v934_v13, %v934_v13  ;;  %v727_v14 = vmax.f32 %v1520_v50, 0.0001  ;;  %v731_v15 = vsub.f32 %v2384_v0, %v705_v43 }
  0xc6   : > { %1686 = vlog2.f32 %v939_v24  ;;  %v1007_v17 = vmul.f32 %v935_v16, %v935_v16  ;;  %v719_v58 = vmax.f32 %v2526_v56, 0.0001  ;;  %v728_v18 = vmax.f32 %v1521_v57, 0.0001 }
  0xc7   : > { %v732_v19 = vsub.f32 %v2387_v1, %v706_v48  ;;  %v720_v21 = vmax.f32 %v2533_v61, 0.0001  ;;  %v721_v11 = vmax.f32 %v2536_v62, 0.0001  ;;  %v733_v13 = vsub.f32 %v2390_v2, %v707_v55 }
  0xc8   : > { %v734_v22 = vsub.f32 %v2393_v3, %v708_v60  ;;  %v729_v24 = vmax.f32 %v1522_v8, 0.0001  ;;  %v730_v25 = vmax.f32 %v1523_v12, 0.0001  ;;  %v735_v16 = vsub.f32 %v2396_v4, %v1516_v7 }
  0xc9   : > { %v739_v26 = vmul.f32 %v727_v14, %v718_v63  ;;  %v2553_v27 = vadd.f32 %v1004_v59, %v1000_v46  ;;  %v736_v28 = vsub.f32 %v2399_v5, %v1517_v51  ;;  %v743_v29 = vand.u32 2147483647, %v731_v15 }
  0xca   : > { %v744_v32 = vand.u32 2147483647, %v732_v19  ;;  %v737_v34 = vsub.f32 %v2408_v9, %v1518_v20  ;;  %v740_v39 = vmul.f32 %v728_v18, %v719_v58  ;;  %v745_v40 = vand.u32 2147483647, %v733_v13 }
  0xcb   : > { %1688 = vrcp.f32 %v739_v26  ;;  %v2557_v47 = vadd.f32 %v1005_v6, %v1001_v42  ;;  %v2559_v43 = vadd.f32 %v1006_v44, %v1002_v54  ;;  %v738_v48 = vsub.f32 %v2411_v10, %v1519_v23 }
  0xcc   : > { %v1673_v33 = vpop.eup %1672  ;;  %v746_v50 = vand.u32 2147483647, %v734_v22  ;;  %v2562_v55 = vadd.f32 %v1007_v17, %v1003_v36  ;;  %v741_v56 = vmul.f32 %v729_v24, %v720_v21  ;;  %v742_v57 = vmul.f32 %v730_v25, %v721_v11 }
  0xcd   : > { %v1675_v41 = vpop.eup %1674  ;;  %v751_v59 = vand.u32 2147483647, %v735_v16  ;;  %v961_v61 = vmul.f32 %v1673_v33, %v2509_v49  ;;  %v747_v62 = vmul.f32 %v743_v29, %v727_v14  ;;  %v748_v7 = vmul.f32 %v744_v32, %v728_v18 }
  0xce   : > { %v1677_v46 = vpop.eup %1676  ;;  %v752_v8 = vand.u32 2147483647, %v736_v28  ;;  %v963_v42 = vmul.f32 %v1675_v41, %v2511_v35  ;;  %v749_v54 = vmul.f32 %v745_v40, %v729_v24  ;;  %v753_v6 = vand.u32 2147483647, %v737_v34 }
  0xcf   : > { %v1679_v60 = vpop.eup %1678  ;;  %1690 = vrcp.f32 %v740_v39  ;;  %v965_v15 = vmul.f32 %v1677_v46, %v2518_v53  ;;  %v750_v17 = vmul.f32 %v746_v50, %v730_v25  ;;  %v754_v51 = vand.u32 2147483647, %v738_v48  ;;  %v2583_v48 = vld [vmem:[%s2366_s11] sm:$0xff]  ;;  %v2589_v46 = vld [vmem:[%s2368_s16 + $0x8] sm:$0xff] }
  0xd0   : > { %v1681_v12 = vpop.eup %1680  ;;  %v967_v20 = vmul.f32 %v1679_v60, %v2520_v30  ;;  %v755_v49 = vmul.f32 %v751_v59, %v718_v63  ;;  %1692 = vrcp.f32 %v741_v56  ;;  %v756_v23 = vmul.f32 %v752_v8, %v719_v58  ;;  %v2586_v50 = vld [vmem:[%s2368_s16] sm:$0xff]  ;;  %v805_v60 = vld [vmem:[%s2366_s11 + $0x8] sm:$0xff]  ;;  %v2600_v8 = vld [vmem:[%s2368_s16 + $0x10] sm:$0xff] }
  0xd1   : > { %v1683_v44 = vpop.eup %1682  ;;  %v969_v36 = vmul.f32 0.6931472, %v1681_v12  ;;  %1694 = vrcp.f32 %v742_v57  ;;  %v757_v16 = vmul.f32 %v753_v6, %v720_v21  ;;  %v758_v25 = vmul.f32 %v754_v51, %v721_v11  ;;  %v2603_v12 = vld [vmem:[%s2368_s16 + $0x18] sm:$0xff]  ;;  %v1530_v51 = vld [vmem:[%s2368_s16 + $0x30] sm:$0xff] }
  0xd2   : > { %v1685_v19 = vpop.eup %1684  ;;  %v971_v13 = vmul.f32 0.6931472, %v1683_v44  ;;  %1696 = vlog2.f32 %v739_v26  ;;  %v759_v26 = vadd.f32 %v755_v49, %v747_v62  ;;  %v760_v40 = vadd.f32 %v756_v23, %v748_v7  ;;  %v807_v62 = vld [vmem:[%s2366_s11 + $0x18] sm:$0xff]  ;;  %v2597_v7 = vld [vmem:[%s2366_s11 + $0x20] sm:$0xff] }
  0xd3   : > { %v1687_v14 = vpop.eup %1686  ;;  %v973_v18 = vmul.f32 0.6931472, %v1685_v19  ;;  %v976_v22 = vadd.f32 %v969_v36, %v961_v61  ;;  %1698 = vlog2.f32 %v740_v39  ;;  %v761_v41 = vadd.f32 %v757_v16, %v749_v54  ;;  %v806_v61 = vld [vmem:[%s2366_s11 + $0x10] sm:$0xff]  ;;  %v1531_v19 = vld [vmem:[%s2368_s16 + $0x38] sm:$0xff] }
  0xd4   : > { %v975_v35 = vmul.f32 0.6931472, %v1687_v14  ;;  %v977_v24 = vadd.f32 %v971_v13, %v963_v42  ;;  %1700 = vlog2.f32 %v741_v56  ;;  %v1017_v59 = vand.u32 2147483648, %v2553_v27  ;;  %v1528_v42 = vld [vmem:[%s2368_s16 + $0x20] sm:$0xff]  ;;  %v2613_v36 = vld [vmem:[%s2366_s11 + $0x30] sm:$0xff]  ;;  %v2620_v49 = vld [vmem:[%s2366_s11 + $0x38] sm:$0xff] }
  0xd5   : > { %v978_v28 = vadd.f32 %v973_v18, %v965_v15  ;;  %v980_v53 = vsel %vm2439_vm9, %v976_v22, 0.0  ;;  %1702 = vlog2.f32 %v742_v57  ;;  %v762_v57 = vadd.f32 %v758_v25, %v750_v17  ;;  %v2610_v15 = vld [vmem:[%s2366_s11 + $0x28] sm:$0xff]  ;;  %s1205_s11 = scalar_lea.sflag [#allocation4], %s2340_s20 }
  0xd6   : > { %v979_v29 = vadd.f32 %v975_v35, %v967_v20  ;;  %v981_v30 = vsel %vm2451_vm10, %v977_v24, 0.0  ;;  %v984_v63 = vsel %vm787_vm0, %v980_v53, 0.0  ;;  %1704 = vrsqrt.f32 %v2553_v27  ;;  %v1529_v17 = vld [vmem:[%s2368_s16 + $0x28] sm:$0xff]  ;;  %s2061_s16 = smov [#allocation16]  }
  0xd7   : > { %v982_v58 = vsel %vm2465_vm11, %v978_v28, 0.0  ;;  %v985_v21 = vsel %vm787_vm0, %v981_v30, 0.0  ;;  %1706 = vrsqrt.f32 %v2557_v47  ;;  %v1024_v6 = vand.u32 2147483648, %v2557_v47  ;;  %s1956_s14 = sshll.u32 %s2061_s16, 4  ;;  %s1957_s14 = int_to_ptr.vmem [resolvable:$false] %s1956_s14 }
  0xd8   : > { %v983_v11 = vsel %vm2480_vm12, %v979_v29, 0.0  ;;  %v986_v32 = vadd.f32 %v985_v21, %v984_v63  ;;  %v987_v33 = vsel %vm787_vm0, %v982_v58, 0.0  ;;  %v1689_v34 = vpop.eup %1688  ;;  %1708 = vrsqrt.f32 %v2559_v43  ;;  %s1958_s18 = scalar_lea.vmem %s1957_s14, 256  ;;  %p1959_p4 = scmp.lt.s32.totalorder %s1220_s19, %s1957_s14 }
  0xd9   : > { %v989_v39 = vsel %vm787_vm0, %v983_v11, 0.0  ;;  %v764_v54 = vmul.f32 %v1689_v34, %v759_v26  ;;  %v1031_v44 = vand.u32 2147483648, %v2559_v43  ;;  %1710 = vrsqrt.f32 %v2562_v55  ;;  %p1960_p5 = scmp.lt.s32.totalorder %s1958_s18, %s1952_s15 }
  0xda   : > { %v988_v56 = vadd.f32 %v987_v33, %v986_v32  ;;  %v1038_v13 = vand.u32 2147483648, %v2562_v55  ;;  %v817_v14 = vmax.f32 %v2586_v50, 0.0001  ;;  %v818_v18 = vmax.f32 %v2589_v46, 0.0001 }
  0xdb   : > { %vm1014_vm13 = vcmp.eq.f32.partialorder %v2553_v27, inf  ;;  %v819_v23 = vmax.f32 %v2600_v8, 0.0001  ;;  %v2908_v35 = vmax.f32 %v2603_v12, 0.0001  ;;  %v830_v16 = vsub.f32 %v2384_v0, %v2583_v48  ;;  %p1961_p6 = por %p1960_p5, %p1959_p4 }
  0xdc   : > { %v990_v20 = vadd.f32 %v989_v39, %v988_v56  ;;  %v1691_v22 = vpop.eup %1690  ;;  %v826_v24 = vmax.f32 %v1528_v42, 0.0001  ;;  %vm1016_vm14 = vcmp.eq.f32.partialorder %v2553_v27, 0.0  ;;  %v827_v53 = vmax.f32 %v1529_v17, 0.0001 }
  0xdd   : > { %v766_v28 = vmul.f32 %v1691_v22, %v760_v40  ;;  %v828_v25 = vmax.f32 %v1530_v51, 0.0001  ;;  %v829_v29 = vmax.f32 %v1531_v19, 0.0001  ;;  %v1693_v30 = vpop.eup %1692  ;;  %vm1021_vm15 = vcmp.eq.f32.partialorder %v2557_v47, inf  ;;  %p1962_p1 = pnand %p1961_p6, %p1955_p3 }
  0xde   : > { %991 = vadd.xlane.f32.xlu1 %v990_v20  ;;  %vm1028_vm1 = vcmp.eq.f32.partialorder %v2559_v43, inf  ;;  %v831_v63 = vsub.f32 %v2387_v1, %v805_v60  ;;  %v832_v58 = vsub.f32 %v2390_v2, %v806_v61  ;;  %v833_v21 = vsub.f32 %v2393_v3, %v807_v62  ;;  %v1695_v26 = vpop.eup %1694 }
  0xdf   : > { %v834_v0 = vsub.f32 %v2396_v4, %v2597_v7  ;;  %v768_v11 = vmul.f32 %v1693_v30, %v761_v41  ;;  %vm1023_vm2 = vcmp.eq.f32.partialorder %v2557_v47, 0.0  ;;  %vm1030_vm3 = vcmp.eq.f32.partialorder %v2559_v43, 0.0  ;;  %v1697_v2 = vpop.eup %1696 }
  0xe0   : > { %v835_v32 = vsub.f32 %v2399_v5, %v2610_v15  ;;  %v836_v33 = vsub.f32 %v2408_v9, %v2613_v36  ;;  %v837_v1 = vsub.f32 %v2411_v10, %v2620_v49  ;;  %v770_v3 = vmul.f32 %v1695_v26, %v762_v57  ;;  %v1699_v39 = vpop.eup %1698 }
  0xe1   : > { %vm1035_vm4 = vcmp.eq.f32.partialorder %v2562_v55, inf  ;;  %v2648_v4 = vmul.f32 %v826_v24, %v817_v14  ;;  %v2652_v34 = vmul.f32 %v827_v53, %v818_v18  ;;  %v2656_v5 = vmul.f32 %v828_v25, %v819_v23  ;;  %v1701_v57 = vpop.eup %1700 }
  0xe2   : > { %v772_v40 = vmul.f32 0.6931472, %v1697_v2  ;;  %vm1037_vm5 = vcmp.eq.f32.partialorder %v2562_v55, 0.0  ;;  %v2661_v41 = vmul.f32 %v829_v29, %v2908_v35  ;;  %v842_v48 = vand.u32 2147483647, %v830_v16  ;;  %v1703_v7 = vpop.eup %1702 }
  0xe3   : > { %v843_v56 = vand.u32 2147483647, %v831_v63  ;;  %v774_v60 = vmul.f32 0.6931472, %v1699_v39  ;;  %v844_v61 = vand.u32 2147483647, %v832_v58  ;;  %1712 = vrcp.f32 %v2648_v4  ;;  %v1705_v19 = vpop.eup %1704 }
  0xe4   : > { %v845_v62 = vand.u32 2147483647, %v833_v21  ;;  %v776_v42 = vmul.f32 0.6931472, %v1701_v57  ;;  %v779_v15 = vadd.f32 %v772_v40, %v764_v54  ;;  %v846_v17 = vmul.f32 %v842_v48, %v826_v24  ;;  %v1707_v2 = vpop.eup %1706 }
  0xe5   : > { %v847_v51 = vmul.f32 %v843_v56, %v827_v53  ;;  %v778_v20 = vmul.f32 0.6931472, %v1703_v7  ;;  %v780_v22 = vadd.f32 %v774_v60, %v766_v28  ;;  %v848_v30 = vmul.f32 %v844_v61, %v828_v25  ;;  %v1709_v21 = vpop.eup %1708 }
  0xe6   : > { %v849_v26 = vmul.f32 %v845_v62, %v829_v29  ;;  %v781_v35 = vadd.f32 %v776_v42, %v768_v11  ;;  %v783_v16 = vsel %vm2439_vm9, %v779_v15, 0.0  ;;  %v1013_v63 = vmul.f32 %v1705_v19, %v2553_v27  ;;  %v1711_v28 = vpop.eup %1710 }
  0xe7   : > { %v850_v58 = vand.u32 2147483647, %v834_v0  ;;  %v782_v39 = vadd.f32 %v778_v20, %v770_v3  ;;  %v784_v54 = vsel %vm2451_vm10, %v780_v22, 0.0  ;;  %v788_v24 = vsel %vm787_vm0, %v783_v16, 0.0 }
  0xe8   : > { %v1020_v53 = vmul.f32 %v1707_v2, %v2557_v47  ;;  %v785_v25 = vsel %vm2465_vm11, %v781_v35, 0.0  ;;  %v789_v29 = vsel %vm787_vm0, %v784_v54, 0.0  ;;  %v1015_v11 = vsel %vm1014_vm13, %v2553_v27, %v1013_v63 }
  0xe9   : > { %v1027_v0 = vmul.f32 %v1709_v21, %v2559_v43  ;;  %v786_v3 = vsel %vm2480_vm12, %v782_v39, 0.0  ;;  %v790_v40 = vadd.f32 %v789_v29, %v788_v24  ;;  %v791_v48 = vsel %vm787_vm0, %v785_v25, 0.0 }
  0xea   : > { %v2685_v56 = vsel %vm1016_vm14, %v1017_v59, %v1015_v11  ;;  %v793_v35 = vsel %vm787_vm0, %v786_v3, 0.0  ;;  %v1022_v57 = vsel %vm1021_vm15, %v2557_v47, %v1020_v53  ;;  %v1034_v61 = vmul.f32 %v1711_v28, %v2562_v55 }
  0xeb   : > { %v1029_v60 = vsel %vm1028_vm1, %v2559_v43, %v1027_v0  ;;  %v792_v62 = vadd.f32 %v791_v48, %v790_v40  ;;  %v2699_v27 = vsel %vm1023_vm2, %v1024_v6, %v1022_v57  ;;  %vm1084_vm6 = vcmp.lt.f32.partialorder %v2685_v56, 1.0 }
  0xec   : > { %v2705_v59 = vsel %vm1030_vm3, %v1031_v44, %v1029_v60  ;;  %v1036_v7 = vsel %vm1035_vm4, %v2562_v55, %v1034_v61  ;;  %vm1085_vm7 = vcmp.lt.f32.partialorder %v2699_v27, 1.0  ;;  %vm1088_vm13 = vmand %vm2439_vm9, %vm1084_vm6  ;;  %v851_v47 = vand.u32 2147483647, %v835_v32 }
  0xed   : > { %vm1086_vm8 = vcmp.lt.f32.partialorder %v2705_v59, 1.0  ;;  %v794_v6 = vadd.f32 %v793_v35, %v792_v62  ;;  %v2719_v43 = vsel %vm1037_vm5, %v1038_v13, %v1036_v7  ;;  %vm1089_vm14 = vmand %vm2451_vm10, %vm1085_vm7  ;;  %v1092_v44 = vsel %vm1088_vm13, 1.0, %v2060_v38 }
  0xee   : > { %v852_v42 = vand.u32 2147483647, %v836_v33  ;;  %vm1087_vm15 = vcmp.lt.f32.partialorder %v2719_v43, 1.0  ;;  %vm1090_vm1 = vmand %vm2465_vm11, %vm1086_vm8  ;;  %v1093_v32 = vsel %vm1089_vm14, 1.0, %v2060_v38  ;;  %v1096_v55 = vsel %vm787_vm0, %v1092_v44, 0.0 }
  0xef   : > { %v853_v13 = vand.u32 2147483647, %v837_v1  ;;  %795 = vadd.xlane.f32.xlu0 %v794_v6  ;;  %vm1091_vm2 = vmand %vm2480_vm12, %vm1087_vm15  ;;  %v1094_v9 = vsel %vm1090_vm1, 1.0, %v2060_v38  ;;  %v1097_v36 = vsel %vm787_vm0, %v1093_v32, 0.0  ;;  %v854_v33 = vmul.f32 %v850_v58, %v817_v14 }
  0xf0   : > { %v855_v15 = vmul.f32 %v851_v47, %v818_v18  ;;  %v1713_v19 = vpop.eup %1712  ;;  %v1095_v20 = vsel %vm1091_vm2, 1.0, %v2060_v38  ;;  %v1098_v22 = vadd.f32 %v1097_v36, %v1096_v55  ;;  %v1099_v10 = vsel %vm787_vm0, %v1094_v9, 0.0 }
  0xf1   : > { %v856_v49 = vmul.f32 %v852_v42, %v819_v23  ;;  %v1101_v1 = vsel %vm787_vm0, %v1095_v20, 0.0  ;;  %v2944_v2 = vmax.f32 %v2603_v12, 0.0001  ;;  %v858_v63 = vadd.f32 %v854_v33, %v846_v17 }
  0xf2   : > { %v859_v50 = vadd.f32 %v855_v15, %v847_v51  ;;  %v1100_v14 = vadd.f32 %v1099_v10, %v1098_v22  ;;  %1714 = vrcp.f32 %v2652_v34  ;;  %vm1140_vm3 = vcmp.lt.f32.partialorder %v2685_v56, 5.0 }
  0xf3   : > { %v857_v16 = vmul.f32 %v853_v13, %v2944_v2  ;;  %v860_v58 = vadd.f32 %v856_v49, %v848_v30  ;;  %1716 = vrcp.f32 %v2656_v5  ;;  %vm1141_vm4 = vcmp.lt.f32.partialorder %v2699_v27, 5.0  ;;  %vm1144_vm5 = vmand %vm2439_vm9, %vm1140_vm3 }
  0xf4   : > { %v1102_v8 = vadd.f32 %v1101_v1, %v1100_v14  ;;  %1718 = vrcp.f32 %v2661_v41  ;;  %vm1142_vm6 = vcmp.lt.f32.partialorder %v2705_v59, 5.0  ;;  %vm1143_vm7 = vcmp.lt.f32.partialorder %v2719_v43, 5.0  ;;  %vm1145_vm8 = vmand %vm2451_vm10, %vm1141_vm4 }
  0xf5   : > { %v861_v46 = vadd.f32 %v857_v16, %v849_v26  ;;  %1720 = vlog2.f32 %v2648_v4  ;;  %vm1146_vm13 = vmand %vm2465_vm11, %vm1142_vm6  ;;  %v1148_v12 = vsel %vm1144_vm5, 1.0, %v2060_v38  ;;  %v1149_v18 = vsel %vm1145_vm8, 1.0, %v2060_v38 }
  0xf6   : > { %1103 = vadd.xlane.f32.xlu1 %v1102_v8  ;;  %1722 = vlog2.f32 %v2652_v34  ;;  %vm1147_vm14 = vmand %vm2480_vm12, %vm1143_vm7  ;;  %v1150_v23 = vsel %vm1146_vm13, 1.0, %v2060_v38  ;;  %v1152_v17 = vsel %vm787_vm0, %v1148_v12, 0.0  ;;  %v1153_v51 = vsel %vm787_vm0, %v1149_v18, 0.0 }
  0xf7   : > { %1724 = vlog2.f32 %v2656_v5  ;;  %v1151_v4 = vsel %vm1147_vm14, 1.0, %v2060_v38  ;;  %v1154_v30 = vadd.f32 %v1153_v51, %v1152_v17  ;;  %v1155_v26 = vsel %vm787_vm0, %v1150_v23, 0.0 }
  0xf8   : > { %1726 = vlog2.f32 %v2661_v41  ;;  %v1157_v34 = vsel %vm787_vm0, %v1151_v4, 0.0  ;;  %vm1112_vm15 = vcmp.lt.f32.partialorder %v2685_v56, 3.0  ;;  %v1064_v5 = vsel %vm2439_vm9, %v2685_v56, 0.0 }
  0xf9   : > { %v1156_v21 = vadd.f32 %v1155_v26, %v1154_v30  ;;  %vm1113_vm1 = vcmp.lt.f32.partialorder %v2699_v27, 3.0  ;;  %v863_v28 = vmul.f32 %v1713_v19, %v858_v63  ;;  %v1065_v41 = vsel %vm2451_vm10, %v2699_v27, 0.0  ;;  %vm2787_vm2 = vmand %vm2439_vm9, %vm1112_vm15 }
  0xfa   : > { %v1066_v48 = vsel %vm2465_vm11, %v2705_v59, 0.0  ;;  %v1068_v56 = vsel %vm787_vm0, %v1064_v5, 0.0  ;;  %vm1117_vm3 = vmand %vm2451_vm10, %vm1113_vm1  ;;  %v1069_v61 = vsel %vm787_vm0, %v1065_v41, 0.0  ;;  %vm1114_vm4 = vcmp.lt.f32.partialorder %v2705_v59, 3.0 }
  0xfb   : > { %v1158_v39 = vadd.f32 %v1157_v34, %v1156_v21  ;;  %v1067_v47 = vsel %vm2480_vm12, %v2719_v43, 0.0  ;;  %v1120_v42 = vsel %vm2787_vm2, 1.0, %v2060_v38  ;;  %v1121_v32 = vsel %vm1117_vm3, 1.0, %v2060_v38  ;;  %vm1118_vm5 = vmand %vm2465_vm11, %vm1114_vm4 }
  0xfc   : > { %v1070_v59 = vadd.f32 %v1069_v61, %v1068_v56  ;;  %v1071_v9 = vsel %vm787_vm0, %v1066_v48, 0.0  ;;  %vm1115_vm6 = vcmp.lt.f32.partialorder %v2719_v43, 3.0  ;;  %v1124_v20 = vsel %vm787_vm0, %v1120_v42, 0.0 }
  0xfd   : > { %1159 = vadd.xlane.f32.xlu1 %v1158_v39  ;;  %v1125_v22 = vsel %vm787_vm0, %v1121_v32, 0.0  ;;  %v1122_v1 = vsel %vm1118_vm5, 1.0, %v2060_v38  ;;  %v1073_v63 = vsel %vm787_vm0, %v1067_v47, 0.0 }
  0xfe   : > { %v1072_v43 = vadd.f32 %v1071_v9, %v1070_v59  ;;  %v1126_v16 = vadd.f32 %v1125_v22, %v1124_v20 }
  0xff   : > { %v1715_v54 = vpop.eup %1714 }
 0x100   : > { %v1717_v24 = vpop.eup %1716  ;;  %v865_v29 = vmul.f32 %v1715_v54, %v859_v50  ;;  %v1127_v50 = vsel %vm787_vm0, %v1122_v1, 0.0 }
 0x101   : > { %v1719_v53 = vpop.eup %1718  ;;  %v867_v3 = vmul.f32 %v1717_v24, %v860_v58  ;;  %v1128_v8 = vadd.f32 %v1127_v50, %v1126_v16 }
 0x102   : > { %v1721_v25 = vpop.eup %1720  ;;  %v869_v57 = vmul.f32 %v1719_v53, %v861_v46  ;;  %v1074_v46 = vadd.f32 %v1073_v63, %v1072_v43  ;;  %v675_v63 = vlaneseq }
 0x103   : > { %v1723_v0 = vpop.eup %1722  ;;  %v871_v40 = vmul.f32 0.6931472, %v1721_v25 }
 0x104   : > { %v1725_v35 = vpop.eup %1724  ;;  %v873_v60 = vmul.f32 0.6931472, %v1723_v0  ;;  %v676_v50 = vshrl.u32 %v675_v63, 7 }
 0x105   : > { %v1727_v62 = vpop.eup %1726  ;;  %v875_v27 = vmul.f32 0.6931472, %v1725_v35  ;;  %v878_v7 = vadd.f32 %v871_v40, %v863_v28 }
 0x106   : > { %v877_v6 = vmul.f32 0.6931472, %v1727_v62  ;;  %v879_v44 = vadd.f32 %v873_v60, %v865_v29 }
 0x107   : > { %v880_v55 = vadd.f32 %v875_v27, %v867_v3  ;;  %v882_v13 = vsel %vm2439_vm9, %v878_v7, 0.0  ;;  %vm1119_vm9 = vmand %vm2480_vm12, %vm1115_vm6 }
 0x108   : > { %v881_v36 = vadd.f32 %v877_v6, %v869_v57  ;;  %v883_v33 = vsel %vm2451_vm10, %v879_v44, 0.0  ;;  %v886_v15 = vsel %vm787_vm0, %v882_v13, 0.0  ;;  %v1123_v58 = vsel %vm1119_vm9, 1.0, %v2060_v38 }
 0x109   : > { %v884_v19 = vsel %vm2465_vm11, %v880_v55, 0.0  ;;  %v887_v31 = vsel %vm787_vm0, %v883_v33, 0.0  ;;  %v1129_v12 = vsel %vm787_vm0, %v1123_v58, 0.0 }
 0x10a   : > { %v885_v10 = vsel %vm2480_vm12, %v881_v36, 0.0  ;;  %v888_v49 = vadd.f32 %v887_v31, %v886_v15  ;;  %v889_v37 = vsel %vm787_vm0, %v884_v19, 0.0  ;;  %v1130_v18 = vadd.f32 %v1129_v12, %v1128_v8 }
 0x10b   : > { %v891_v2 = vsel %vm787_vm0, %v885_v10, 0.0  ;;  %vm1170_vm0 = vcmp.eq.s32.totalorder %v676_v50, 0 }
 0x10c   : > { %v890_v45 = vadd.f32 %v889_v37, %v888_v49 }
 0x10e   : > { %v892_v14 = vadd.f32 %v891_v2, %v890_v45 }
 0x110   : > { %893 = vadd.xlane.f32.xlu0 %v892_v14  ;;  %v1169_v14 = vand.u32 127, %v675_v63 }
 0x112   : > { %vm1171_vm10 = vcmp.eq.s32.totalorder %v1169_v14, 0  ;;  %vm1175_vm11 = vcmp.eq.s32.totalorder %v1169_v14, 1  ;;  %vm1179_vm12 = vcmp.eq.s32.totalorder %v1169_v14, 2  ;;  %vm1183_vm8 = vcmp.eq.s32.totalorder %v1169_v14, 3 }
 0x113   : > { %vm1172_vm7 = vmand %vm1170_vm0, %vm1171_vm10  ;;  %vm1187_vm15 = vcmp.eq.s32.totalorder %v1169_v14, 4  ;;  %vm1191_vm3 = vcmp.eq.s32.totalorder %v1169_v14, 5  ;;  %vm1195_vm4 = vcmp.eq.s32.totalorder %v1169_v14, 6  ;;  %vm1199_vm5 = vcmp.eq.s32.totalorder %v1169_v14, 7 }
 0x114   : > { %1075 = vadd.xlane.f32.xlu0 %v1074_v46  ;;  %vm1176_vm13 = vmand %vm1170_vm0, %vm1175_vm11 }
 0x115   : > { %vm1180_vm14 = vmand %vm1170_vm0, %vm1179_vm12 }
 0x116   : > { %vm1184_vm1 = vmand %vm1170_vm0, %vm1183_vm8 }
 0x117   : > { %vm1188_vm2 = vmand %vm1170_vm0, %vm1187_vm15 }
 0x118   : > { %1131 = vadd.xlane.f32.xlu0 %v1130_v18  ;;  %vm1192_vm6 = vmand %vm1170_vm0, %vm1191_vm3 }
 0x119   : > { %vm1196_vm9 = vmand %vm1170_vm0, %vm1195_vm4 }
 0x11a   : > { %vm1200_vm10 = vmand %vm1170_vm0, %vm1199_vm5 }
 0x148   : > { %v1056_v34 = vpop.xlane.xlu1 %1055 }
 0x149   : > { %v1057_v54 = vrot.slane %v1056_v34, 4 }
 0x14b   : > { %v1058_v53 = vadd.f32 %v1057_v54, %v1056_v34 }
 0x14d   : > { %v1059_v0 = vrot.slane %v1058_v53, 2 }
 0x14f   : > { %v1060_v62 = vadd.f32 %v1059_v0, %v1058_v53 }
 0x151   : > { %v1061_v59 = vrot.slane %v1060_v62, 1 }
 0x153   : > { %v1062_v22 = vadd.f32 %v1061_v59, %v1060_v62 }
 0x167   : > { %v992_v21 = vpop.xlane.xlu1 %991 }
 0x168   : > { %v993_v38 = vrot.slane %v992_v21, 4 }
 0x16a   : > { %v994_v24 = vadd.f32 %v993_v38, %v992_v21 }
 0x16c   : > { %v995_v41 = vrot.slane %v994_v24, 2 }
 0x16e   : > { %v996_v57 = vadd.f32 %v995_v41, %v994_v24 }
 0x170   : > { %v997_v44 = vrot.slane %v996_v57, 1 }
 0x172   : > { %v998_v19 = vadd.f32 %v997_v44, %v996_v57 }
 0x178   : > { %v796_v52 = vpop.xlane.xlu0 %795 }
 0x179   : > { %v797_v23 = vrot.slane %v796_v52, 4 }
 0x17b   : > { %v798_v17 = vadd.f32 %v797_v23, %v796_v52 }
 0x17d   : > { %v799_v51 = vrot.slane %v798_v17, 2 }
 0x17f   : > { %v800_v4 = vadd.f32 %v799_v51, %v798_v17  ;;  %v1104_v39 = vpop.xlane.xlu1 %1103 }
 0x180   : > { %v1105_v5 = vrot.slane %v1104_v39, 4 }
 0x181   : > { %v801_v30 = vrot.slane %v800_v4, 1 }
 0x182   : > { %v1106_v25 = vadd.f32 %v1105_v5, %v1104_v39 }
 0x183   : > { %v802_v26 = vadd.f32 %v801_v30, %v800_v4 }
 0x184   : > { %v1107_v48 = vrot.slane %v1106_v25, 2 }
 0x185   : > { %1556 = vpush %v802_v26 }
 0x186   : > { %v1160_v28 = vpop.xlane.xlu1 %1159  ;;  %v1108_v42 = vadd.f32 %v1107_v48, %v1106_v25 }
 0x187   : > { %v1161_v11 = vrot.slane %v1160_v28, 4 }
 0x188   : > { %v1109_v31 = vrot.slane %v1108_v42, 1 }
 0x189   : > { %v1162_v56 = vadd.f32 %v1161_v11, %v1160_v28 }
 0x18a   : > { %v1110_v1 = vadd.f32 %v1109_v31, %v1108_v42 }
 0x18b   : > { %v1163_v47 = vrot.slane %v1162_v56, 2 }
 0x18d   : > { %v1164_v15 = vadd.f32 %v1163_v47, %v1162_v56 }
 0x18f   : > { %v1165_v2 = vrot.slane %v1164_v15, 1 }
 0x191   : > { %v1166_v16 = vadd.f32 %v1165_v2, %v1164_v15 }
 0x199   : > { %v894_v29 = vpop.xlane.xlu0 %893 }
 0x19a   : > { %v895_v3 = vrot.slane %v894_v29, 4 }
 0x19c   : > { %v896_v40 = vadd.f32 %v895_v3, %v894_v29 }
 0x19d   : > { %v1076_v35 = vpop.xlane.xlu0 %1075 }
 0x19e   : > { %v897_v60 = vrot.slane %v896_v40, 2  ;;  %v1077_v61 = vrot.slane %v1076_v35, 4 }
 0x1a0   : > { %v1078_v27 = vadd.f32 %v1077_v61, %v1076_v35  ;;  %v898_v7 = vadd.f32 %v897_v60, %v896_v40 }
 0x1a1   : > { %v1132_v6 = vpop.xlane.xlu0 %1131 }
 0x1a2   : > { %v1079_v32 = vrot.slane %v1078_v27, 2  ;;  %v1133_v55 = vrot.slane %v1132_v6, 4  ;;  %v899_v13 = vrot.slane %v898_v7, 1 }
 0x1a4   : > { %v1134_v9 = vadd.f32 %v1133_v55, %v1132_v6  ;;  %v900_v36 = vadd.f32 %v899_v13, %v898_v7  ;;  %v1080_v33 = vadd.f32 %v1079_v32, %v1078_v27 }
 0x1a6   : > { %v1135_v20 = vrot.slane %v1134_v9, 2  ;;  %1558 = vpush %v900_v36  ;;  %v1081_v10 = vrot.slane %v1080_v33, 1 }
 0x1a7   : > { %1560 = vpush %v998_v19 }
 0x1a8   : > { %v1136_v49 = vadd.f32 %v1135_v20, %v1134_v9  ;;  %1562 = vpush %v1062_v22  ;;  %v1082_v37 = vadd.f32 %v1081_v10, %v1080_v33 }
 0x1aa   : > { %1564 = vpush %v1082_v37  ;;  %v1137_v45 = vrot.slane %v1136_v49, 1 }
 0x1ab   : > { %1566 = vpush %v1110_v1 }
 0x1ac   : > { %v1138_v43 = vadd.f32 %v1137_v45, %v1136_v49 }
 0x1ae   : > { %1568 = vpush %v1138_v43 }
 0x1af   : > { %1570 = vpush %v1166_v16 }
 0x1b6   : > { %s1557_s17 = spop %1556 }
 0x1b7   : > { %v1173_v58 = vstv %s1557_s17 }
 0x1b8   : > { %v1174_v46 = vsel %vm1172_vm7, %v1173_v58, 0.0 }
 0x1d7   : > { %s1559_s30 = spop %1558 }
 0x1d8   : > { %v1177_v8 = vstv %s1559_s30  ;;  %s1561_s13 = spop %1560 }
 0x1d9   : > { %v1178_v12 = vsel %vm1176_vm13, %v1177_v8, %v1174_v46  ;;  %v1181_v18 = vstv %s1561_s13  ;;  %s1563_s3 = spop %1562 }
 0x1da   : > { %v1182_v52 = vsel %vm1180_vm14, %v1181_v18, %v1178_v12  ;;  %v1185_v23 = vstv %s1563_s3 }
 0x1db   : > { %v1186_v17 = vsel %vm1184_vm1, %v1185_v23, %v1182_v52  ;;  %s1565_s10 = spop %1564 }
 0x1dc   : > { %v1189_v51 = vstv %s1565_s10  ;;  %s1567_s21 = spop %1566 }
 0x1dd   : > { %v1190_v4 = vsel %vm1188_vm2, %v1189_v51, %v1186_v17  ;;  %v1193_v30 = vstv %s1567_s21 }
 0x1de   : > { %v1194_v26 = vsel %vm1192_vm6, %v1193_v30, %v1190_v4 }
 0x1df   : > { %s1569_s12 = spop %1568 }
 0x1e0   : > { %v1197_v34 = vstv %s1569_s12  ;;  %s1571_s27 = spop %1570 }
 0x1e1   : > { %v1198_v21 = vsel %vm1196_vm9, %v1197_v34, %v1194_v26  ;;  %v1201_v39 = vstv %s1571_s27 }
 0x1e2   : > { %v1202_v38 = vsel %vm1200_vm10, %v1201_v39, %v1198_v21 }
 0x1e3   : > { %1203 = vst [vmem:[%s640_s23] sm:$0xff] %v1202_v38 }
 0x1e4   : > { %1965 = shalt.err (!%p1962_p1)
}
 0x1e5   : > { %s1966_s1 = scalar_lea.hbm %s2844_s9, 128  ;;  %s1970_s30 = scalar_lea.hbm %s2949_s26, 256 }
 0x1e6   : > { %p1967_p2 = scmp.ne.s32.totalorder %s2844_s9, %s1966_s1  ;;  %p1971_p13 = scmp.lt.s32.totalorder %s2844_s9, %s2949_s26 }
 0x1e7   : > { %p1972_p12 = scmp.lt.s32.totalorder %s1970_s30, %s1966_s1 }
 0x1e8   : > { %p1968_p7 = pnand %p1967_p2, %p2162_p9 }
 0x1e9   : > { %p1973_p8 = por %p1972_p12, %p1971_p13 }
 0x1ea   : > { %p1969_p10 = pneg %p1968_p7 }
 0x1ec   : > { %p1974_p0 = pnand %p1973_p8, %p1969_p10 }
 0x1ee   : > { %1977 = shalt.err (!%p1974_p0)
}
 0x1ef   : > { %1588 = dma.vmem_to_hbm [thread:$0]  (%p2162_p9), %s1220_s19, 128, %s2844_s9, %s1205_s11  }
 0x1f0 PF: > { %s2950_s25 = sld [smem:[#allocation23_spill]] }
 0x1f1   : > { %s2952_s10 = sld [smem:[#allocation27_spill]] }
 0x1f6   : > { %s1231_s21 = sand.u32 1, %s2950_s25  }
 0x1f7   : > { %p2953_p3 = scmp.ge.s32.totalorder %s2952_s10, 2  ;;  %s1232_s22 = scalar_lea.sflag [#allocation4], %s1231_s21 }
 0x1f9   : > { %p1616_p4 = pnand %p2953_p3, %p2169_p11 }
 0x1fb   : > { %p1617_p5 = pneg %p1616_p4 }
 0x1fd   : > { %2023 = dma.done.wait (%p1617_p5), %s1232_s22, 128  }
 0x1fe   : > { %2025 = vsyncadd (%p1617_p5), %s1232_s22, 4294967168  ;;  %s36_s10 = sadd.s32 1, %s2952_s10   ;;  %s2954_s23 = sld [smem:[#allocation24_spill]] }
 0x1ff   : > { %p33_p6 = scmp.ge.s32.totalorder %s36_s10, 4   ;;  %s2955_s29 = sld [smem:[#allocation31_spill]] }
 0x200   : > { %s2956_s30 = sld [smem:[#allocation26_spill]]  ;;  %s2958_s27 = smov %s2032_s28 }
 0x201   : > { %s2957_s9 = sld [smem:[#allocation29_spill]]  ;;  %35 = sbr.rel (!%p33_p6) target bundleno = 19 (0x13), region = 189 }
 0x204   : > { %s2959_s28 = smov %s2954_s23 }
 0x206   :  { %1237 = vsyncpa [#allocation3], 1 }
 0x207   :  { %1239 = vsyncpa [#allocation3 + $0x1], 1 }
 0x208   :  { %1240 = vsyncpa [#allocation6], 1 }
 0x209   :  { %1242 = vsyncpa [#allocation6 + $0x1], 1 }
 0x20a   :  { %1243 = vsyncpa [#allocation9], 1 }
 0x20b   :  { %1245 = vsyncpa [#allocation9 + $0x1], 1 }
 0x20c   :  { %1246 = vsyncpa [#allocation12], 1 }
 0x20d   :  { %1248 = vsyncpa [#allocation12 + $0x1], 1 }
 0x20e   :  { %1249 = vsyncpa [#allocation15], 1 }
 0x20f   :  { %1251 = vsyncpa [#allocation15 + $0x1], 1 }
 0x210   :  { %1252 = vsyncpa [#allocation4], 1 }
 0x211   :  { %1254 = vsyncpa [#allocation4 + $0x1], 1 }

</bundles_post_ra>
